<compile_context>
chip_gen: v7x
topology: tpu7x:2x2x1
jax: 0.10.0
libtpu: 0.0.40
codegen_flags: <defaults>
</compile_context>

<pallas_src>
import math

import jax
import jax.numpy as jnp
from jax import lax
from jax.experimental import pallas as pl
from jax.experimental.pallas import tpu as pltpu


def _round_up(x, m):
    return ((x + m - 1) // m) * m


def _vmem_capacity_bytes():
    """Best-effort per-core VMEM capacity; conservative (v7x-sized) fallback."""
    try:
        info = pltpu.get_tpu_info()
        cap = getattr(info, "vmem_capacity_bytes", None)
        if cap:
            return int(cap)
    except Exception:
        pass
    return 64 << 20


def _budgets():
    """(vmem_capacity, per-input-tile budget, vmem_limit) — generation aware."""
    cap = _vmem_capacity_bytes()
    if cap >= (96 << 20):                 # 128 MiB parts (v5e / v6e)
        return cap, 14 << 20, 80 << 20
    return cap, 9 << 20, 44 << 20         # 64 MiB parts (v7x)


def _tile_sizes(TH, Wp, C, Cout, in_itemsize, out_itemsize):
    """Returns (N, FlatPad, input_tile_bytes, est_vmem_usage_bytes)."""
    N = TH * Wp
    flat = (TH + 2) * Wp
    flat_pad = _round_up(flat + 2, 8)      # +2 tail so the last (kh=2,kw=2) slice stays in-bounds
    in_tile = flat_pad * C * in_itemsize
    out_rows = max(Cout, 8)                # sublane padding of the (Cout, N) blocks
    usage = (2 * in_tile                   # double-buffered input
             + 2 * out_rows * N * out_itemsize   # double-buffered output
             + out_rows * N * 4            # f32 scratch accumulator
             + (1 << 20))                  # weights / bias / slack
    return N, flat_pad, in_tile, usage


def _pick_row_tile(H, Wp, C, Cout, in_itemsize, out_itemsize, tile_budget, vmem_limit):
    divisors = sorted((d for d in range(1, H + 1) if H % d == 0), reverse=True)
    fitting = []
    for d in divisors:
        _, _, in_tile, usage = _tile_sizes(d, Wp, C, Cout, in_itemsize, out_itemsize)
        if in_tile <= tile_budget and usage <= vmem_limit:
            fitting.append(d)
    if not fitting:
        raise ValueError(
            f"OutputProj: no row tile fits VMEM (H={H}, W={Wp - 2}, C={C}); "
            f"tile_budget={tile_budget >> 20} MiB, vmem_limit={vmem_limit >> 20} MiB.")
    th = fitting[0]                         # largest fitting divisor
    if H // th == 1:
        # Single-tile grid: prefer >=2 row steps (still meaty tiles) so the
        # ("parallel","parallel") grid can shard across v7x's two TensorCores.
        split = [d for d in fitting if d < H and d >= max(4, H // 8)]
        if split:
            th = split[0]
    return th


def output_proj(x, weight, bias, *, compute_dtype=jnp.bfloat16, row_tile=None):
    """Pallas TPU forward pass of OutputProj.

    x: (B, L, C) with L a perfect square; weight: (Cout, Cin, 3, 3); bias: (Cout,).
    Returns (B, Cout, H, W), matching the PyTorch module.

    compute_dtype: MXU operand dtype (default bf16; accumulation is always f32).
    row_tile: output rows per grid step (must divide H); None -> auto.
    """
    B, L, C = x.shape
    H = int(round(math.sqrt(L)))
    W = H
    assert H * W == L, f"L={L} is not a perfect square"
    Cout, Cin, KH, KW = weight.shape
    assert Cin == C and KH == 3 and KW == 3

    in_dtype = jnp.bfloat16 if compute_dtype is None else compute_dtype
    in_itemsize = jnp.dtype(in_dtype).itemsize
    out_itemsize = jnp.dtype(x.dtype).itemsize
    Wp = W + 2                                            # padded row width

    # ---- Host-side (XLA) staging -------------------------------------------
    # (B, L, C) is NHWC storage of the NCHW tensor PyTorch builds; keep NHWC.
    # Cast to the compute dtype FIRST so pad/gather and the kernel DMA move
    # compute-dtype bytes, not f32.
    x_nhwc = x.reshape(B, H, W, C).astype(in_dtype)
    x_pad = jnp.pad(x_nhwc, ((0, 0), (1, 1), (1, 1), (0, 0)))   # (B, H+2, Wp, C)

    cap, tile_budget, vmem_limit = _budgets()
    if row_tile is None:
        TH = _pick_row_tile(H, Wp, C, Cout, in_itemsize, out_itemsize,
                            tile_budget, vmem_limit)
    else:
        TH = int(row_tile)
        if H % TH != 0:
            raise ValueError(f"row_tile={TH} must divide H={H}")
    T = H // TH
    N, FlatPad, _, usage = _tile_sizes(TH, Wp, C, Cout, in_itemsize, out_itemsize)
    if usage > vmem_limit:
        raise ValueError(
            f"row_tile={TH} needs ~{usage >> 20} MiB VMEM > limit "
            f"{vmem_limit >> 20} MiB (VMEM capacity {cap >> 20} MiB).")
    Flat = (TH + 2) * Wp

    # Row tiling with a materialized 2-row halo (blocks never overlap), then
    # flatten (rows, padded-cols) so every (kh, kw) tap is a contiguous slice.
    row_ids = jnp.arange(T)[:, None] * TH + jnp.arange(TH + 2)[None, :]
    xtiles = x_pad[:, row_ids]                            # (B, T, TH+2, Wp, C)
    xflat = xtiles.reshape(B, T, Flat, C)
    xflat = jnp.pad(xflat, ((0, 0), (0, 0), (0, FlatPad - Flat), (0, 0)))

    # Weights: (Cout,Cin,3,3) -> (kh*3+kw, Cout, Cin); bias as (Cout,1) f32.
    w_k = jnp.transpose(weight, (2, 3, 0, 1)).reshape(9, Cout, C).astype(in_dtype)
    b2d = bias.reshape(Cout, 1).astype(jnp.float32)

    # ---- Kernel --------------------------------------------------------------
    def conv_kernel(x_ref, w_ref, b_ref, o_ref, acc_ref):
        # x_ref : (1, 1, FlatPad, C)  flattened padded row tile
        # w_ref : (9, Cout, C)        per-(kh,kw) matmul LHS
        # b_ref : (Cout, 1)           bias
        # o_ref : (1, 1, Cout, N)     lane-dense output slab (N = TH*Wp)
        # acc_ref: VMEM (Cout, N) f32 scratch accumulator
        acc_ref[...] = jnp.broadcast_to(b_ref[...], (Cout, N))   # bias init
        for kh in range(3):                                       # static unroll: 9 taps
            for kw in range(3):
                start = kh * Wp + kw
                patch = x_ref[0, 0, start:start + N, :]           # (N, C) shifted slice
                # (Cout, C) . (N, C)^T -> (Cout, N): spatial stays on lanes.
                acc_ref[...] += lax.dot_general(
                    w_ref[kh * 3 + kw], patch,
                    dimension_numbers=(((1,), (1,)), ((), ())),
                    preferred_element_type=jnp.float32)
        o_ref[0, 0] = acc_ref[...].astype(o_ref.dtype)

    flops = 2 * B * H * W * Cout * 9 * Cin
    bytes_accessed = (B * T * FlatPad * C * in_itemsize        # staged input read
                      + B * T * Cout * N * out_itemsize        # output write
                      + 9 * Cout * C * in_itemsize + Cout * 4)  # weights + bias

    out = pl.pallas_call(
        conv_kernel,
        out_shape=jax.ShapeDtypeStruct((B, T, Cout, N), x.dtype),
        grid_spec=pltpu.PrefetchScalarGridSpec(
            num_scalar_prefetch=0,
            grid=(B, T),
            in_specs=[
                pl.BlockSpec((1, 1, FlatPad, C), lambda b, t: (b, t, 0, 0)),
                pl.BlockSpec((9, Cout, C), lambda b, t: (0, 0, 0)),
                pl.BlockSpec((Cout, 1), lambda b, t: (0, 0)),
            ],
            out_specs=pl.BlockSpec((1, 1, Cout, N), lambda b, t: (b, t, 0, 0)),
            scratch_shapes=[pltpu.VMEM((Cout, N), jnp.float32)],
        ),
        compiler_params=pltpu.CompilerParams(
            dimension_semantics=("parallel", "parallel"),
            vmem_limit_bytes=int(min(vmem_limit, max(usage + (4 << 20), 32 << 20))),
        ),
        cost_estimate=pl.CostEstimate(
            flops=flops, transcendentals=0, bytes_accessed=bytes_accessed),
    )(xflat, w_k, b2d)

    # (B, T, Cout, TH*Wp) -> (B, Cout, H, Wp) -> strip the 2 junk pad columns.
    out = out.reshape(B, T, Cout, TH, Wp)
    out = jnp.transpose(out, (0, 2, 1, 3, 4)).reshape(B, Cout, H, Wp)
    return out[:, :, :, :W]


def _reference(x, weight, bias):
    B, L, C = x.shape
    H = W = int(round(math.sqrt(L)))
    x_nchw = jnp.transpose(x, (0, 2, 1)).reshape(B, C, H, W)
    out = lax.conv_general_dilated(
        x_nchw, weight, window_strides=(1, 1), padding=((1, 1), (1, 1)),
        dimension_numbers=("NCHW", "OIHW", "NCHW"))
    return out + bias.reshape(1, -1, 1, 1)


if __name__ == "__main__":
    key = jax.random.PRNGKey(0)
    k_x, k_w, k_b = jax.random.split(key, 3)

    in_channel, out_channel, ksize = 64, 3, 3
    B, H, W = 2, 16, 16
    L = H * W

    x = jax.random.normal(k_x, (B, L, in_channel), dtype=jnp.float32)

    # Deterministic init mimicking PyTorch Conv2d defaults.
    fan_in = in_channel * ksize * ksize
    bound_w = math.sqrt(6.0 / fan_in)
    bound_b = 1.0 / math.sqrt(fan_in)
    weight = jax.random.uniform(
        k_w, (out_channel, in_channel, ksize, ksize),
        minval=-bound_w, maxval=bound_w, dtype=jnp.float32)
    bias = jax.random.uniform(
        k_b, (out_channel,), minval=-bound_b, maxval=bound_b, dtype=jnp.float32)

    ref = _reference(x, weight, bias)

    # Default path: bf16 MXU operands (f32 accumulation), auto row tiling
    # (picker forces T=2 here, exercising the multi-tile grid / megacore path).
    out = output_proj(x, weight, bias)
    jax.block_until_ready(out)
    assert out.shape == (B, out_channel, H, W)
    assert jnp.allclose(out, ref, atol=8e-2, rtol=8e-2)

    # Full-precision path with an explicit single-tile grid (T=1) for exact check.
    out_f32 = output_proj(x, weight, bias, compute_dtype=jnp.float32, row_tile=16)
    jax.block_until_ready(out_f32)
    assert jnp.allclose(out_f32, ref, atol=1e-4, rtol=1e-4)

    print("KERNEL_OK")
</pallas_src>

<mosaic_0001>
module attributes {stable_mosaic.version = 11 : i64} {
  func.func @conv_kernel(%arg0: i32, %arg1: i32, %arg2: memref<1x1x184x64xbf16, #tpu.memory_space<vmem>>, %arg3: memref<9x3x64xbf16, #tpu.memory_space<vmem>>, %arg4: memref<3x1xf32, #tpu.memory_space<vmem>>, %arg5: memref<1x1x3x144xf32, #tpu.memory_space<vmem>>, %arg6: memref<3x144xf32, #tpu.memory_space<vmem>>) attributes {dimension_semantics = [#tpu.dimension_semantics<parallel>, #tpu.dimension_semantics<parallel>], iteration_bounds = array<i64: 2, 2>, scalar_prefetch = 0 : i64, scratch_operands = 1 : i64, tpu.core_type = #tpu.core_type<tc>, window_params = [{transform_indices = @transform_0, window_bounds = array<i64: 1, 1, 184, 64>}, {pipeline_mode = #tpu.pipeline_mode<synchronous>, transform_indices = @transform_1, window_bounds = array<i64: 9, 3, 64>}, {pipeline_mode = #tpu.pipeline_mode<synchronous>, transform_indices = @transform_2, window_bounds = array<i64: 3, 1>}, {transform_indices = @transform_3, window_bounds = array<i64: 1, 1, 3, 144>}]} {
    %c0 = arith.constant 0 : index
    %c0_0 = arith.constant 0 : index
    %0 = vector.load %arg4[%c0, %c0_0] : memref<3x1xf32, #tpu.memory_space<vmem>>, vector<3x1xf32>
    %1 = vector.shape_cast %0 : vector<3x1xf32> to vector<3x1xf32>
    %2 = vector.broadcast %1 : vector<3x1xf32> to vector<3x144xf32>
    %c0_1 = arith.constant 0 : index
    %c0_2 = arith.constant 0 : index
    %3 = vector.load %arg6[%c0_1, %c0_2] : memref<3x144xf32, #tpu.memory_space<vmem>>, vector<3x144xf32>
    tpu.vector_store %arg6[%c0_1, %c0_2], %2 {strides = array<i32>} : memref<3x144xf32, #tpu.memory_space<vmem>>, vector<3x144xf32>,
    %c0_3 = arith.constant 0 : index
    %c0_4 = arith.constant 0 : index
    %c0_5 = arith.constant 0 : index
    %c0_6 = arith.constant 0 : index
    %4 = vector.load %arg2[%c0_3, %c0_4, %c0_5, %c0_6] : memref<1x1x184x64xbf16, #tpu.memory_space<vmem>>, vector<1x1x144x64xbf16>
    %5 = vector.shape_cast %4 : vector<1x1x144x64xbf16> to vector<144x64xbf16>
    %c0_7 = arith.constant 0 : index
    %c0_8 = arith.constant 0 : index
    %6 = vector.load %arg6[%c0_7, %c0_8] : memref<3x144xf32, #tpu.memory_space<vmem>>, vector<3x144xf32>
    %c0_9 = arith.constant 0 : index
    %c0_10 = arith.constant 0 : index
    %c0_11 = arith.constant 0 : index
    %7 = vector.load %arg3[%c0_9, %c0_10, %c0_11] : memref<9x3x64xbf16, #tpu.memory_space<vmem>>, vector<1x3x64xbf16>
    %8 = vector.shape_cast %7 : vector<1x3x64xbf16> to vector<3x64xbf16>
    %cst = arith.constant dense<0.000000e+00> : vector<3x144xf32>
    %9 = tpu.matmul %8, %5, %cst {dimension_numbers = #tpu.dot_dimension_numbers<[1], [1], [0], [0], [0, 0, 1, 0], [], []>} : vector<3x64xbf16>, vector<144x64xbf16>, vector<3x144xf32> -> vector<3x144xf32>
    %10 = arith.addf %6, %9 : vector<3x144xf32>
    %c0_12 = arith.constant 0 : index
    %c0_13 = arith.constant 0 : index
    %11 = vector.load %arg6[%c0_12, %c0_13] : memref<3x144xf32, #tpu.memory_space<vmem>>, vector<3x144xf32>
    tpu.vector_store %arg6[%c0_12, %c0_13], %10 {strides = array<i32>} : memref<3x144xf32, #tpu.memory_space<vmem>>, vector<3x144xf32>,
    %c0_14 = arith.constant 0 : index
    %c0_15 = arith.constant 0 : index
    %c1 = arith.constant 1 : index
    %c0_16 = arith.constant 0 : index
    %12 = vector.load %arg2[%c0_14, %c0_15, %c1, %c0_16] : memref<1x1x184x64xbf16, #tpu.memory_space<vmem>>, vector<1x1x144x64xbf16>
    %13 = vector.shape_cast %12 : vector<1x1x144x64xbf16> to vector<144x64xbf16>
    %c0_17 = arith.constant 0 : index
    %c0_18 = arith.constant 0 : index
    %14 = vector.load %arg6[%c0_17, %c0_18] : memref<3x144xf32, #tpu.memory_space<vmem>>, vector<3x144xf32>
    %c1_19 = arith.constant 1 : index
    %c0_20 = arith.constant 0 : index
    %c0_21 = arith.constant 0 : index
    %15 = vector.load %arg3[%c1_19, %c0_20, %c0_21] : memref<9x3x64xbf16, #tpu.memory_space<vmem>>, vector<1x3x64xbf16>
    %16 = vector.shape_cast %15 : vector<1x3x64xbf16> to vector<3x64xbf16>
    %cst_22 = arith.constant dense<0.000000e+00> : vector<3x144xf32>
    %17 = tpu.matmul %16, %13, %cst_22 {dimension_numbers = #tpu.dot_dimension_numbers<[1], [1], [0], [0], [0, 0, 1, 0], [], []>} : vector<3x64xbf16>, vector<144x64xbf16>, vector<3x144xf32> -> vector<3x144xf32>
    %18 = arith.addf %14, %17 : vector<3x144xf32>
    %c0_23 = arith.constant 0 : index
    %c0_24 = arith.constant 0 : index
    %19 = vector.load %arg6[%c0_23, %c0_24] : memref<3x144xf32, #tpu.memory_space<vmem>>, vector<3x144xf32>
    tpu.vector_store %arg6[%c0_23, %c0_24], %18 {strides = array<i32>} : memref<3x144xf32, #tpu.memory_space<vmem>>, vector<3x144xf32>,
    %c0_25 = arith.constant 0 : index
    %c0_26 = arith.constant 0 : index
    %c2 = arith.constant 2 : index
    %c0_27 = arith.constant 0 : index
    %20 = vector.load %arg2[%c0_25, %c0_26, %c2, %c0_27] : memref<1x1x184x64xbf16, #tpu.memory_space<vmem>>, vector<1x1x144x64xbf16>
    %21 = vector.shape_cast %20 : vector<1x1x144x64xbf16> to vector<144x64xbf16>
    %c0_28 = arith.constant 0 : index
    %c0_29 = arith.constant 0 : index
    %22 = vector.load %arg6[%c0_28, %c0_29] : memref<3x144xf32, #tpu.memory_space<vmem>>, vector<3x144xf32>
    %c2_30 = arith.constant 2 : index
    %c0_31 = arith.constant 0 : index
    %c0_32 = arith.constant 0 : index
    %23 = vector.load %arg3[%c2_30, %c0_31, %c0_32] : memref<9x3x64xbf16, #tpu.memory_space<vmem>>, vector<1x3x64xbf16>
    %24 = vector.shape_cast %23 : vector<1x3x64xbf16> to vector<3x64xbf16>
    %cst_33 = arith.constant dense<0.000000e+00> : vector<3x144xf32>
    %25 = tpu.matmul %24, %21, %cst_33 {dimension_numbers = #tpu.dot_dimension_numbers<[1], [1], [0], [0], [0, 0, 1, 0], [], []>} : vector<3x64xbf16>, vector<144x64xbf16>, vector<3x144xf32> -> vector<3x144xf32>
    %26 = arith.addf %22, %25 : vector<3x144xf32>
    %c0_34 = arith.constant 0 : index
    %c0_35 = arith.constant 0 : index
    %27 = vector.load %arg6[%c0_34, %c0_35] : memref<3x144xf32, #tpu.memory_space<vmem>>, vector<3x144xf32>
    tpu.vector_store %arg6[%c0_34, %c0_35], %26 {strides = array<i32>} : memref<3x144xf32, #tpu.memory_space<vmem>>, vector<3x144xf32>,
    %c0_36 = arith.constant 0 : index
    %c0_37 = arith.constant 0 : index
    %c18 = arith.constant 18 : index
    %c0_38 = arith.constant 0 : index
    %28 = vector.load %arg2[%c0_36, %c0_37, %c18, %c0_38] : memref<1x1x184x64xbf16, #tpu.memory_space<vmem>>, vector<1x1x144x64xbf16>
    %29 = vector.shape_cast %28 : vector<1x1x144x64xbf16> to vector<144x64xbf16>
    %c0_39 = arith.constant 0 : index
    %c0_40 = arith.constant 0 : index
    %30 = vector.load %arg6[%c0_39, %c0_40] : memref<3x144xf32, #tpu.memory_space<vmem>>, vector<3x144xf32>
    %c3 = arith.constant 3 : index
    %c0_41 = arith.constant 0 : index
    %c0_42 = arith.constant 0 : index
    %31 = vector.load %arg3[%c3, %c0_41, %c0_42] : memref<9x3x64xbf16, #tpu.memory_space<vmem>>, vector<1x3x64xbf16>
    %32 = vector.shape_cast %31 : vector<1x3x64xbf16> to vector<3x64xbf16>
    %cst_43 = arith.constant dense<0.000000e+00> : vector<3x144xf32>
    %33 = tpu.matmul %32, %29, %cst_43 {dimension_numbers = #tpu.dot_dimension_numbers<[1], [1], [0], [0], [0, 0, 1, 0], [], []>} : vector<3x64xbf16>, vector<144x64xbf16>, vector<3x144xf32> -> vector<3x144xf32>
    %34 = arith.addf %30, %33 : vector<3x144xf32>
    %c0_44 = arith.constant 0 : index
    %c0_45 = arith.constant 0 : index
    %35 = vector.load %arg6[%c0_44, %c0_45] : memref<3x144xf32, #tpu.memory_space<vmem>>, vector<3x144xf32>
    tpu.vector_store %arg6[%c0_44, %c0_45], %34 {strides = array<i32>} : memref<3x144xf32, #tpu.memory_space<vmem>>, vector<3x144xf32>,
    %c0_46 = arith.constant 0 : index
    %c0_47 = arith.constant 0 : index
    %c19 = arith.constant 19 : index
    %c0_48 = arith.constant 0 : index
    %36 = vector.load %arg2[%c0_46, %c0_47, %c19, %c0_48] : memref<1x1x184x64xbf16, #tpu.memory_space<vmem>>, vector<1x1x144x64xbf16>
    %37 = vector.shape_cast %36 : vector<1x1x144x64xbf16> to vector<144x64xbf16>
    %c0_49 = arith.constant 0 : index
    %c0_50 = arith.constant 0 : index
    %38 = vector.load %arg6[%c0_49, %c0_50] : memref<3x144xf32, #tpu.memory_space<vmem>>, vector<3x144xf32>
    %c4 = arith.constant 4 : index
    %c0_51 = arith.constant 0 : index
    %c0_52 = arith.constant 0 : index
    %39 = vector.load %arg3[%c4, %c0_51, %c0_52] : memref<9x3x64xbf16, #tpu.memory_space<vmem>>, vector<1x3x64xbf16>
    %40 = vector.shape_cast %39 : vector<1x3x64xbf16> to vector<3x64xbf16>
    %cst_53 = arith.constant dense<0.000000e+00> : vector<3x144xf32>
    %41 = tpu.matmul %40, %37, %cst_53 {dimension_numbers = #tpu.dot_dimension_numbers<[1], [1], [0], [0], [0, 0, 1, 0], [], []>} : vector<3x64xbf16>, vector<144x64xbf16>, vector<3x144xf32> -> vector<3x144xf32>
    %42 = arith.addf %38, %41 : vector<3x144xf32>
    %c0_54 = arith.constant 0 : index
    %c0_55 = arith.constant 0 : index
    %43 = vector.load %arg6[%c0_54, %c0_55] : memref<3x144xf32, #tpu.memory_space<vmem>>, vector<3x144xf32>
    tpu.vector_store %arg6[%c0_54, %c0_55], %42 {strides = array<i32>} : memref<3x144xf32, #tpu.memory_space<vmem>>, vector<3x144xf32>,
    %c0_56 = arith.constant 0 : index
    %c0_57 = arith.constant 0 : index
    %c20 = arith.constant 20 : index
    %c0_58 = arith.constant 0 : index
    %44 = vector.load %arg2[%c0_56, %c0_57, %c20, %c0_58] : memref<1x1x184x64xbf16, #tpu.memory_space<vmem>>, vector<1x1x144x64xbf16>
    %45 = vector.shape_cast %44 : vector<1x1x144x64xbf16> to vector<144x64xbf16>
    %c0_59 = arith.constant 0 : index
    %c0_60 = arith.constant 0 : index
    %46 = vector.load %arg6[%c0_59, %c0_60] : memref<3x144xf32, #tpu.memory_space<vmem>>, vector<3x144xf32>
    %c5 = arith.constant 5 : index
    %c0_61 = arith.constant 0 : index
    %c0_62 = arith.constant 0 : index
    %47 = vector.load %arg3[%c5, %c0_61, %c0_62] : memref<9x3x64xbf16, #tpu.memory_space<vmem>>, vector<1x3x64xbf16>
    %48 = vector.shape_cast %47 : vector<1x3x64xbf16> to vector<3x64xbf16>
    %cst_63 = arith.constant dense<0.000000e+00> : vector<3x144xf32>
    %49 = tpu.matmul %48, %45, %cst_63 {dimension_numbers = #tpu.dot_dimension_numbers<[1], [1], [0], [0], [0, 0, 1, 0], [], []>} : vector<3x64xbf16>, vector<144x64xbf16>, vector<3x144xf32> -> vector<3x144xf32>
    %50 = arith.addf %46, %49 : vector<3x144xf32>
    %c0_64 = arith.constant 0 : index
    %c0_65 = arith.constant 0 : index
    %51 = vector.load %arg6[%c0_64, %c0_65] : memref<3x144xf32, #tpu.memory_space<vmem>>, vector<3x144xf32>
    tpu.vector_store %arg6[%c0_64, %c0_65], %50 {strides = array<i32>} : memref<3x144xf32, #tpu.memory_space<vmem>>, vector<3x144xf32>,
    %c0_66 = arith.constant 0 : index
    %c0_67 = arith.constant 0 : index
    %c36 = arith.constant 36 : index
    %c0_68 = arith.constant 0 : index
    %52 = vector.load %arg2[%c0_66, %c0_67, %c36, %c0_68] : memref<1x1x184x64xbf16, #tpu.memory_space<vmem>>, vector<1x1x144x64xbf16>
    %53 = vector.shape_cast %52 : vector<1x1x144x64xbf16> to vector<144x64xbf16>
    %c0_69 = arith.constant 0 : index
    %c0_70 = arith.constant 0 : index
    %54 = vector.load %arg6[%c0_69, %c0_70] : memref<3x144xf32, #tpu.memory_space<vmem>>, vector<3x144xf32>
    %c6 = arith.constant 6 : index
    %c0_71 = arith.constant 0 : index
    %c0_72 = arith.constant 0 : index
    %55 = vector.load %arg3[%c6, %c0_71, %c0_72] : memref<9x3x64xbf16, #tpu.memory_space<vmem>>, vector<1x3x64xbf16>
    %56 = vector.shape_cast %55 : vector<1x3x64xbf16> to vector<3x64xbf16>
    %cst_73 = arith.constant dense<0.000000e+00> : vector<3x144xf32>
    %57 = tpu.matmul %56, %53, %cst_73 {dimension_numbers = #tpu.dot_dimension_numbers<[1], [1], [0], [0], [0, 0, 1, 0], [], []>} : vector<3x64xbf16>, vector<144x64xbf16>, vector<3x144xf32> -> vector<3x144xf32>
    %58 = arith.addf %54, %57 : vector<3x144xf32>
    %c0_74 = arith.constant 0 : index
    %c0_75 = arith.constant 0 : index
    %59 = vector.load %arg6[%c0_74, %c0_75] : memref<3x144xf32, #tpu.memory_space<vmem>>, vector<3x144xf32>
    tpu.vector_store %arg6[%c0_74, %c0_75], %58 {strides = array<i32>} : memref<3x144xf32, #tpu.memory_space<vmem>>, vector<3x144xf32>,
    %c0_76 = arith.constant 0 : index
    %c0_77 = arith.constant 0 : index
    %c37 = arith.constant 37 : index
    %c0_78 = arith.constant 0 : index
    %60 = vector.load %arg2[%c0_76, %c0_77, %c37, %c0_78] : memref<1x1x184x64xbf16, #tpu.memory_space<vmem>>, vector<1x1x144x64xbf16>
    %61 = vector.shape_cast %60 : vector<1x1x144x64xbf16> to vector<144x64xbf16>
    %c0_79 = arith.constant 0 : index
    %c0_80 = arith.constant 0 : index
    %62 = vector.load %arg6[%c0_79, %c0_80] : memref<3x144xf32, #tpu.memory_space<vmem>>, vector<3x144xf32>
    %c7 = arith.constant 7 : index
    %c0_81 = arith.constant 0 : index
    %c0_82 = arith.constant 0 : index
    %63 = vector.load %arg3[%c7, %c0_81, %c0_82] : memref<9x3x64xbf16, #tpu.memory_space<vmem>>, vector<1x3x64xbf16>
    %64 = vector.shape_cast %63 : vector<1x3x64xbf16> to vector<3x64xbf16>
    %cst_83 = arith.constant dense<0.000000e+00> : vector<3x144xf32>
    %65 = tpu.matmul %64, %61, %cst_83 {dimension_numbers = #tpu.dot_dimension_numbers<[1], [1], [0], [0], [0, 0, 1, 0], [], []>} : vector<3x64xbf16>, vector<144x64xbf16>, vector<3x144xf32> -> vector<3x144xf32>
    %66 = arith.addf %62, %65 : vector<3x144xf32>
    %c0_84 = arith.constant 0 : index
    %c0_85 = arith.constant 0 : index
    %67 = vector.load %arg6[%c0_84, %c0_85] : memref<3x144xf32, #tpu.memory_space<vmem>>, vector<3x144xf32>
    tpu.vector_store %arg6[%c0_84, %c0_85], %66 {strides = array<i32>} : memref<3x144xf32, #tpu.memory_space<vmem>>, vector<3x144xf32>,
    %c0_86 = arith.constant 0 : index
    %c0_87 = arith.constant 0 : index
    %c38 = arith.constant 38 : index
    %c0_88 = arith.constant 0 : index
    %68 = vector.load %arg2[%c0_86, %c0_87, %c38, %c0_88] : memref<1x1x184x64xbf16, #tpu.memory_space<vmem>>, vector<1x1x144x64xbf16>
    %69 = vector.shape_cast %68 : vector<1x1x144x64xbf16> to vector<144x64xbf16>
    %c0_89 = arith.constant 0 : index
    %c0_90 = arith.constant 0 : index
    %70 = vector.load %arg6[%c0_89, %c0_90] : memref<3x144xf32, #tpu.memory_space<vmem>>, vector<3x144xf32>
    %c8 = arith.constant 8 : index
    %c0_91 = arith.constant 0 : index
    %c0_92 = arith.constant 0 : index
    %71 = vector.load %arg3[%c8, %c0_91, %c0_92] : memref<9x3x64xbf16, #tpu.memory_space<vmem>>, vector<1x3x64xbf16>
    %72 = vector.shape_cast %71 : vector<1x3x64xbf16> to vector<3x64xbf16>
    %cst_93 = arith.constant dense<0.000000e+00> : vector<3x144xf32>
    %73 = tpu.matmul %72, %69, %cst_93 {dimension_numbers = #tpu.dot_dimension_numbers<[1], [1], [0], [0], [0, 0, 1, 0], [], []>} : vector<3x64xbf16>, vector<144x64xbf16>, vector<3x144xf32> -> vector<3x144xf32>
    %74 = arith.addf %70, %73 : vector<3x144xf32>
    %c0_94 = arith.constant 0 : index
    %c0_95 = arith.constant 0 : index
    %75 = vector.load %arg6[%c0_94, %c0_95] : memref<3x144xf32, #tpu.memory_space<vmem>>, vector<3x144xf32>
    tpu.vector_store %arg6[%c0_94, %c0_95], %74 {strides = array<i32>} : memref<3x144xf32, #tpu.memory_space<vmem>>, vector<3x144xf32>,
    %c0_96 = arith.constant 0 : index
    %c0_97 = arith.constant 0 : index
    %76 = vector.load %arg6[%c0_96, %c0_97] : memref<3x144xf32, #tpu.memory_space<vmem>>, vector<3x144xf32>
    %c0_98 = arith.constant 0 : index
    %c0_99 = arith.constant 0 : index
    %c0_100 = arith.constant 0 : index
    %c0_101 = arith.constant 0 : index
    %77 = vector.load %arg5[%c0_98, %c0_99, %c0_100, %c0_101] : memref<1x1x3x144xf32, #tpu.memory_space<vmem>>, vector<1x1x3x144xf32>
    %78 = vector.shape_cast %77 : vector<1x1x3x144xf32> to vector<3x144xf32>
    %79 = vector.shape_cast %76 : vector<3x144xf32> to vector<1x1x3x144xf32>
    tpu.vector_store %arg5[%c0_98, %c0_99, %c0_100, %c0_101], %79 {strides = array<i32>} : memref<1x1x3x144xf32, #tpu.memory_space<vmem>>, vector<1x1x3x144xf32>,
    return
  }
  func.func @transform_0(%arg0: i32, %arg1: i32) -> (i32, i32, i32, i32) {
    %c0_i32 = arith.constant 0 : i32
    %c0_i32_0 = arith.constant 0 : i32
    %c0_i32_1 = arith.constant 0 : i32
    return %arg0, %arg1, %c0_i32, %c0_i32_0 : i32, i32, i32, i32
  }
  func.func @transform_1(%arg0: i32, %arg1: i32) -> (i32, i32, i32) {
    %c0_i32 = arith.constant 0 : i32
    %c0_i32_0 = arith.constant 0 : i32
    %c0_i32_1 = arith.constant 0 : i32
    %c0_i32_2 = arith.constant 0 : i32
    return %c0_i32, %c0_i32_0, %c0_i32_1 : i32, i32, i32
  }
  func.func @transform_2(%arg0: i32, %arg1: i32) -> (i32, i32) {
    %c0_i32 = arith.constant 0 : i32
    %c0_i32_0 = arith.constant 0 : i32
    %c0_i32_1 = arith.constant 0 : i32
    return %c0_i32, %c0_i32_0 : i32, i32
  }
  func.func @transform_3(%arg0: i32, %arg1: i32) -> (i32, i32, i32, i32) {
    %c0_i32 = arith.constant 0 : i32
    %c0_i32_0 = arith.constant 0 : i32
    %c0_i32_1 = arith.constant 0 : i32
    return %arg0, %arg1, %c0_i32, %c0_i32_0 : i32, i32, i32, i32
  }
}

</mosaic_0001>

<bundles_post_ra>
// kernel: tpu_custom_call.1
= control target key start
LH: loop header
LB: loop body
LE: loop exit
PB: predicated region body
PF: predicated region fallthrough
CT: control target
= control target key end

     0   :  { %s2309_s12 = smov 0   ;;  %s2311_s13 = smov 0   ;;  %s2768_s0 = inlined_call_operand.vmem [shape: bf16[2,2,184,64], index: 0, kind: input, shape index: {}]   ;;  %s2769_s1 = inlined_call_operand.vmem [shape: bf16[9,3,64], index: 1, kind: input, shape index: {}]   ;;  %s2770_s2 = inlined_call_operand.vmem [shape: f32[3,1], index: 2, kind: input, shape index: {}]   ;;  %s2771_s3 = inlined_call_operand.vmem [shape: f32[2,2,3,144], index: 3, kind: output, shape index: {}]  }
   0x1   :  { %s2313_s14 = smov 0   ;;  %s2315_s15 = smov 0  }
   0x2   :  { %s2317_s16 = smov 0  }
   0x3 LB: > { %s22_s17 = sadd.s32 1, %s2277_s14  ;;  %s25_s18 = sadd.s32 1, %s2281_s15  ;;  %s2285_s16 = sphi %s2317_s16, %s13_s16   ;;  %s2281_s15 = sphi %s2315_s15, %s2777_s15   ;;  %s2277_s14 = sphi %s2313_s14, %s2776_s14   ;;  %s2273_s13 = sphi %s2311_s13, %s2775_s13   ;;  %s2269_s12 = sphi %s2309_s12, %s2774_s12  }
   0x4   : > { %p23_p0 = scmp.ge.s32.totalorder %s22_s17, 2  ;;  %p2000_p1 = scmp.ge.s32.totalorder %s2285_s16, 1 }
   0x5   : > { %p157_p2 = scmp.lt.s32.totalorder %s2285_s16, 5 }
   0x6   : > { %s2779_s17 = smov (%p23_p0, %s22_s17), 0  ;;  %s2781_s18 = smov (!%p23_p0, %s25_s18), %s2281_s15 }
   0x7   : > { %p158_p3 = pnand %p2000_p1, %p157_p2  ;;  %p27_p4 = scmp.ge.s32.totalorder %s2781_s18, 2 }
   0x8   : > { %p189_p5 = scmp.lt.s32.totalorder (!%p158_p3), %s2273_s13, 1  ;;  %p191_p6 = scmp.lt.s32.totalorder (!%p158_p3), %s2269_s12, 1  ;;  %v2287_v0 = vmov (!%p158_p3), 0   ;;  %vm290_vm0 = vcmask (!%p158_p3), 523264   ;;  %vm438_vm1 = vsmask.f32 (!%p158_p3), 7424 }
   0x9   : > { %s2783_s18 = smov (%p27_p4, %s2781_s18), 0  ;;  %161 = sbr.rel (%p158_p3) target bundleno = 610 (0x262), region = 32 }
   0xa   : > { %321 = vmatprep.subr.bf16.mxu0 (!%p158_p3), %v2287_v0  ;;  %545 = vmatprep.subr.bf16.mxu1 (!%p158_p3), %v2287_v0  ;;  %vm662_vm2 = vcmask (!%p158_p3), 1046528   ;;  %vm995_vm3 = vsmask.f32 (!%p158_p3), 6400  ;;  %vm1232_vm4 = vcmask (!%p158_p3), 1045504   ;;  %vm221_vm5 = vcmask (!%p158_p3), 1042432  }
   0xb   : > { %353 = vmatprep.mubr.bf16.mxu0 (!%p158_p3), %v2287_v0  ;;  %577 = vmatprep.mubr.bf16.mxu1 (!%p158_p3), %v2287_v0  ;;  %vm222_vm6 = vcmask (!%p158_p3), 129028   ;;  %vm1565_vm8 = vsmask.f32 (!%p158_p3), 5376  ;;  %vm1802_vm9 = vcmask (!%p158_p3), 1044480  }
   0xc   : > { %2157 = vset.pattern.permute.xlu0 (!%p158_p3), %v2287_v0  ;;  %vm2556_vm7 = vmor (!%p158_p3), %vm222_vm6, %vm221_vm5 }
  0x10   : > { %s2785_s13 = smov (!%p189_p5, %s2273_s13), 1  ;;  %s2787_s12 = smov (!%p191_p6, %s2269_s12), 1 }
  0x11   : > { %s2114_s19 = smul.u32 46, %s2785_s13  ;;  %s2003_s27 = sshll.u32 %s2785_s13, 2 }
  0x12   : > { %s2113_s20 = smul.u32 23, %s2787_s12 }
  0x14   : > { %s195_s21 = sadd.s32 %s2114_s19, %s2113_s20 }
  0x15   : > { %s2001_s22 = sshll.u32 %s195_s21, 2 }
  0x16   : > { %s2353_s25 = scalar_lea.vmem %s2768_s0, %s2001_s22 }
  0x17   : > { %v2158_v1 = vld [vmem:[%s2353_s25] sm:$0xff]   ;;  %v2159_v3 = vld [vmem:[%s2353_s25 + $0x8] sm:$0xff]   ;;  %v2163_v10 = vld [vmem:[%s2353_s25 + $0x10] sm:$0xff]  }
  0x18   : > { %v295_v2 = vsel %vm290_vm0, %v2158_v1, 0  ;;  %v2160_v4 = vld [vmem:[%s2353_s25] sm:$0xff]   ;;  %v2161_v5 = vld [vmem:[%s2353_s25 + $0x8] sm:$0xff]   ;;  %v298_v13 = vsel %vm290_vm0, %v2159_v3, 0  ;;  %v455_v15 = vshll.u32 %v2163_v10, 16  ;;  %v2165_v19 = vld [vmem:[%s2353_s25 + $0x18] sm:$0xff]  }
  0x19   : > { %322 = vmatpush1.bf16.xpose.msra.mxu0 %v295_v2  ;;  %v440_v6 = vshrl.u32 %v2160_v4, 16  ;;  %v442_v7 = vshll.u32 %v2160_v4, 16  ;;  %v447_v8 = vshll.u32 %v2161_v5, 16  ;;  %v451_v11 = vshrl.u32 %v2161_v5, 16  ;;  %v2162_v21 = vld [vmem:[%s2353_s25 + $0x10] sm:$0xff]   ;;  %v2167_v29 = vld [vmem:[%s2353_s25 + $0x20] sm:$0xff]  }
  0x1a   : > { %323 = vmatprep.subr.bf16.mxu0 %v2287_v0  ;;  %v457_v18 = vrot.slane %v455_v15, 1  ;;  %v459_v23 = vshrl.u32 %v2163_v10, 16  ;;  %v463_v24 = vshll.u32 %v2165_v19, 16  ;;  %v301_v25 = vsel %vm290_vm0, %v2162_v21, 0  ;;  %v2164_v30 = vld [vmem:[%s2353_s25 + $0x18] sm:$0xff]   ;;  %v2169_v38 = vld [vmem:[%s2353_s25 + $0x28] sm:$0xff]  }
  0x1b   : > { %v444_v9 = vrot.slane %v442_v7, 1  ;;  %v449_v12 = vrot.slane %v447_v8, 1  ;;  %v467_v32 = vshrl.u32 %v2165_v19, 16  ;;  %v471_v33 = vshll.u32 %v2167_v29, 16  ;;  %v2166_v39 = vld [vmem:[%s2353_s25 + $0x20] sm:$0xff]   ;;  %v2171_v47 = vld [vmem:[%s2353_s25 + $0x30] sm:$0xff]  }
  0x1c   : > { %v461_v27 = vor.u32 %v459_v23, %v457_v18  ;;  %v465_v28 = vrot.slane %v463_v24, 1  ;;  %v304_v34 = vsel %vm290_vm0, %v2164_v30, 0  ;;  %v475_v41 = vshrl.u32 %v2167_v29, 16  ;;  %v2168_v48 = vld [vmem:[%s2353_s25 + $0x28] sm:$0xff]   ;;  %v2173_v56 = vld [vmem:[%s2353_s25 + $0x38] sm:$0xff]   ;;  %v2170_v57 = vld [vmem:[%s2353_s25 + $0x30] sm:$0xff]  }
  0x1d   : > { %v445_v14 = vor.u32 %v444_v9, %v440_v6  ;;  %v453_v17 = vor.u32 %v451_v11, %v449_v12  ;;  %v473_v37 = vrot.slane %v471_v33, 1  ;;  %v479_v42 = vshll.u32 %v2169_v38, 16  ;;  %v2175_v2 = vld [vmem:[%s2353_s25 + $0x40] sm:$0xff]   ;;  %v2172_v4 = vld [vmem:[%s2353_s25 + $0x38] sm:$0xff]   ;;  %v2177_v15 = vld [vmem:[%s2353_s25 + $0x8] sm:$0xff]  }
  0x1e   : > { %v466_v31 = vsel %vm438_vm1, %v461_v27, %v465_v28  ;;  %v469_v36 = vor.u32 %v467_v32, %v465_v28  ;;  %v307_v43 = vsel %vm290_vm0, %v2166_v39, 0  ;;  %v483_v50 = vshrl.u32 %v2169_v38, 16  ;;  %v208_v3 = vld [vmem:[%s2770_s2] sm:$0x7]  ;;  %v2180_v27 = vld [vmem:[%s2353_s25 + $0x8] sm:$0xfe]  }
  0x1f   : > { %v450_v16 = vsel %vm438_vm1, %v445_v14, %v449_v12  ;;  %v458_v22 = vsel %vm438_vm1, %v453_v17, %v457_v18  ;;  %v525_v35 = vsel %vm290_vm0, %v466_v31, 0  ;;  %v477_v45 = vor.u32 %v475_v41, %v473_v37  ;;  %211 = vperm.xlu0 %2157, %v208_v3   ;;  %v2178_v12 = vld [vmem:[%s2353_s25 + $0x48] ss:$0 sps:$4 sm:$0x11]   ;;  %v2176_v14 = vld [vmem:[%s2353_s25] sm:$0xfe]  }
  0x20   : > { %v519_v20 = vsel %vm290_vm0, %v450_v16, 0  ;;  %v522_v26 = vsel %vm290_vm0, %v458_v22, 0  ;;  %v474_v40 = vsel %vm438_vm1, %v469_v36, %v473_v37  ;;  %v481_v46 = vrot.slane %v479_v42, 1  ;;  %v2181_v29 = vld [vmem:[%s2353_s25 + $0x10] sm:$0xff]   ;;  %v244_v30 = vld [vmem:[%s2769_s1] sm:$0x3] }
  0x21   : > { %324 = vmatpush1.bf16.xpose.msra.mxu0 %v298_v13  ;;  %546 = vmatpush1.bf16.xpose.msra.mxu1 %v519_v20  ;;  %v528_v44 = vsel %vm290_vm0, %v474_v40, 0  ;;  %v487_v51 = vshll.u32 %v2171_v47, 16  ;;  %v310_v52 = vsel %vm290_vm0, %v2168_v48, 0  ;;  %v491_v59 = vshrl.u32 %v2171_v47, 16  ;;  %v2174_v13 = vld [vmem:[%s2353_s25 + $0x40] sm:$0xff]   ;;  %v2182_v36 = vld [vmem:[%s2353_s25 + $0x18] sm:$0xff]  }
  0x22   : > { %325 = vmatprep.subr.bf16.mxu0 %v2287_v0  ;;  %547 = vmatprep.subr.bf16.mxu1 %v2287_v0  ;;  %v482_v49 = vsel %vm438_vm1, %v477_v45, %v481_v46  ;;  %v485_v54 = vor.u32 %v483_v50, %v481_v46  ;;  %v495_v60 = vshll.u32 %v2173_v56, 16  ;;  %v313_v61 = vsel %vm290_vm0, %v2170_v57, 0  ;;  %v2183_v38 = vld [vmem:[%s2353_s25 + $0x18] sm:$0xff]   ;;  %v2015_v39 = vld [vmem:[%s2769_s1 + $0x2] sm:$0x3] }
  0x23   : > { %v531_v53 = vsel %vm290_vm0, %v482_v49, 0  ;;  %v489_v55 = vrot.slane %v487_v51, 1  ;;  %v499_v6 = vshrl.u32 %v2173_v56, 16  ;;  %v503_v7 = vshll.u32 %v2175_v2, 16  ;;  %v2184_v45 = vld [vmem:[%s2353_s25 + $0x20] sm:$0xff]   ;;  %v2187_v56 = vld [vmem:[%s2353_s25 + $0x28] sm:$0xff]  }
  0x24   : > { %v497_v1 = vrot.slane %v495_v60, 1  ;;  %v316_v8 = vsel %vm290_vm0, %v2172_v4, 0  ;;  %v507_v17 = vshrl.u32 %v2175_v2, 16  ;;  %v511_v18 = vshll.u32 %v2178_v12, 16  ;;  %v2185_v47 = vld [vmem:[%s2353_s25 + $0x20] sm:$0xff]  }
  0x25   : > { %v490_v58 = vsel %vm438_vm1, %v485_v54, %v489_v55  ;;  %v493_v63 = vor.u32 %v491_v59, %v489_v55  ;;  %v505_v11 = vrot.slane %v503_v7, 1  ;;  %v319_v19 = vsel %vm290_vm0, %v2174_v13, 0  ;;  %v2190_v7 = vld [vmem:[%s2353_s25 + $0x38] sm:$0xff]  }
  0x26   : > { %v534_v62 = vsel %vm290_vm0, %v490_v58, 0  ;;  %v501_v10 = vor.u32 %v499_v6, %v497_v1  ;;  %v663_v21 = vrot.slane %v2176_v14, 1  ;;  %v664_v22 = vrot.slane %v2177_v15, 1  ;;  %v2192_v15 = vld [vmem:[%s2353_s25 + $0x40] sm:$0xff]  }
  0x27   : > { %v498_v5 = vsel %vm438_vm1, %v493_v63, %v497_v1  ;;  %v509_v23 = vor.u32 %v507_v17, %v505_v11  ;;  %v513_v24 = vrot.slane %v511_v18, 1  ;;  %v668_v42 = vrot.slane %v2182_v36, 1  ;;  %v2189_v1 = vld [vmem:[%s2353_s25 + $0x30] sm:$0xff]  }
  0x28   : > { %v537_v9 = vsel %vm290_vm0, %v498_v5, 0  ;;  %v506_v16 = vsel %vm438_vm1, %v501_v10, %v505_v11  ;;  %v670_v50 = vrot.slane %v2184_v45, 1  ;;  %v836_v60 = vrot.slane %v2187_v56, 1  ;;  %v2200_v56 = vld [vmem:[%s2353_s25 + $0x8] sm:$0xfc]  }
  0x29   : > { %326 = vmatpush1.bf16.xpose.msra.mxu0 %v301_v25  ;;  %548 = vmatpush1.bf16.xpose.msra.mxu1 %v522_v26  ;;  %v540_v20 = vsel %vm290_vm0, %v506_v16, 0  ;;  %v2179_v25 = vld [vmem:[%s2353_s25 + $0x10] sm:$0xff]   ;;  %v665_v26 = vsel %vm662_vm2, %v663_v21, %v664_v22  ;;  %v514_v28 = vsel %vm438_vm1, %v509_v23, %v513_v24  ;;  %v838_v5 = vrot.slane %v2189_v1, 1  ;;  %v2193_v16 = vld [vmem:[%s2353_s25 + $0x40] sm:$0xff]   ;;  %v2195_v23 = vld [vmem:[%s2353_s25 + $0x48] sm:$0xff]  }
  0x2a   : > { %327 = vmatprep.subr.bf16.mxu0 %v2287_v0  ;;  %549 = vmatprep.subr.bf16.mxu1 %v2287_v0  ;;  %v686_v31 = vsel %vm290_vm0, %v665_v26, 0  ;;  %v666_v32 = vrot.slane %v2179_v25, 1  ;;  %v543_v33 = vsel %vm290_vm0, %v514_v28, 0  ;;  %v671_v54 = vsel %vm662_vm2, %v668_v42, %v670_v50  ;;  %v2196_v26 = vld [vmem:[%s2353_s25 + $0x8] sm:$0xfe]  }
  0x2b   : > { %v695_v57 = vsel %vm290_vm0, %v671_v54, 0  ;;  %v676_v12 = vrot.slane %v2190_v7, 1  ;;  %v842_v21 = vrot.slane %v2193_v16, 1  ;;  %v2202_v54 = vld [vmem:[%s2353_s25 + $0x20] sm:$0xff]   ;;  %v1233_v1 = vrot.slane %v2200_v56, 2 }
  0x2c   : > { %v667_v37 = vsel %vm662_vm2, %v664_v22, %v666_v32  ;;  %v669_v46 = vsel %vm662_vm2, %v666_v32, %v668_v42  ;;  %v2194_v22 = vld [vmem:[%s2353_s25 + $0x48] ss:$0 sps:$4 sm:$0x11]   ;;  %v997_v32 = vshrl.u32 %v2196_v26, 16  ;;  %v2199_v42 = vld [vmem:[%s2353_s25 + $0x18] sm:$0xff]  }
  0x2d   : > { %v689_v41 = vsel %vm290_vm0, %v667_v37, 0  ;;  %v692_v49 = vsel %vm290_vm0, %v669_v46, 0 }
  0x31   : > { %328 = vmatpush1.bf16.xpose.msra.mxu0 %v304_v34  ;;  %550 = vmatpush1.bf16.xpose.msra.mxu1 %v525_v35  ;;  %v829_v34 = vrot.slane %v2180_v27, 1  ;;  %v830_v35 = vrot.slane %v2181_v29, 1  ;;  %v2197_v27 = vld [vmem:[%s2353_s25 + $0x10] sm:$0xff]  }
  0x32   : > { %329 = vmatprep.subr.bf16.mxu0 %v2287_v0  ;;  %551 = vmatprep.subr.bf16.mxu1 %v2287_v0 }
  0x33   : > { %v831_v40 = vsel %vm662_vm2, %v829_v34, %v830_v35  ;;  %v1005_v34 = vshrl.u32 %v2197_v27, 16 }
  0x39   : > { %330 = vmatpush1.bf16.xpose.msra.mxu0 %v307_v43  ;;  %552 = vmatpush1.bf16.xpose.msra.mxu1 %v528_v44  ;;  %v852_v43 = vsel %vm290_vm0, %v831_v40, 0  ;;  %v832_v44 = vrot.slane %v2183_v38, 1  ;;  %v999_v38 = vrot.slane %v997_v32, 1  ;;  %v1007_v40 = vrot.slane %v1005_v34, 1 }
  0x3a   : > { %331 = vmatprep.subr.bf16.mxu0 %v2287_v0  ;;  %553 = vmatprep.subr.bf16.mxu1 %v2287_v0 }
  0x3b   : > { %v833_v48 = vsel %vm662_vm2, %v830_v35, %v832_v44  ;;  %v1008_v35 = vshll.u32 %v2197_v27, 16 }
  0x3c   : > { %v855_v51 = vsel %vm290_vm0, %v833_v48, 0  ;;  %v1014_v48 = vshrl.u32 %v2199_v42, 16 }
  0x41   : > { %332 = vmatpush1.bf16.xpose.msra.mxu0 %v310_v52  ;;  %554 = vmatpush1.bf16.xpose.msra.mxu1 %v531_v53  ;;  %v834_v52 = vrot.slane %v2185_v47, 1  ;;  %v2186_v53 = vld [vmem:[%s2353_s25 + $0x28] sm:$0xff]  }
  0x42   : > { %333 = vmatprep.subr.bf16.mxu0 %v2287_v0  ;;  %555 = vmatprep.subr.bf16.mxu1 %v2287_v0  ;;  %v672_v58 = vrot.slane %v2186_v53, 1 }
  0x43   : > { %v835_v55 = vsel %vm662_vm2, %v832_v44, %v834_v52  ;;  %v837_v63 = vsel %vm662_vm2, %v834_v52, %v836_v60  ;;  %v1016_v52 = vrot.slane %v1014_v48, 1 }
  0x44   : > { %v858_v59 = vsel %vm290_vm0, %v835_v55, 0  ;;  %v861_v3 = vsel %vm290_vm0, %v837_v63, 0  ;;  %v1026_v63 = vshll.u32 %v2202_v54, 16 }
  0x49   : > { %334 = vmatpush1.bf16.xpose.msra.mxu0 %v313_v61  ;;  %556 = vmatpush1.bf16.xpose.msra.mxu1 %v534_v62  ;;  %v673_v61 = vsel %vm662_vm2, %v670_v50, %v672_v58  ;;  %v2188_v62 = vld [vmem:[%s2353_s25 + $0x30] sm:$0xff]  }
  0x4a   : > { %335 = vmatprep.subr.bf16.mxu0 %v2287_v0  ;;  %557 = vmatprep.subr.bf16.mxu1 %v2287_v0  ;;  %v698_v2 = vsel %vm290_vm0, %v673_v61, 0  ;;  %v674_v4 = vrot.slane %v2188_v62, 1  ;;  %v1023_v62 = vshrl.u32 %v2202_v54, 16 }
  0x4c   : > { %v675_v6 = vsel %vm662_vm2, %v672_v58, %v674_v4  ;;  %v677_v14 = vsel %vm662_vm2, %v674_v4, %v676_v12  ;;  %v2027_v58 = vld [vmem:[%s2769_s1 + $0x4] sm:$0x3]  ;;  %v1025_v4 = vrot.slane %v1023_v62, 1 }
  0x4d   : > { %v701_v10 = vsel %vm290_vm0, %v675_v6, 0  ;;  %v704_v18 = vsel %vm290_vm0, %v677_v14, 0  ;;  %v2204_v6 = vld [vmem:[%s2353_s25 + $0x28] sm:$0xff]  }
  0x4e   : > { %v1035_v14 = vshll.u32 %v2204_v6, 16 }
  0x51   : > { %336 = vmatpush1.bf16.xpose.msra.mxu0 %v316_v8  ;;  %558 = vmatpush1.bf16.xpose.msra.mxu1 %v537_v9  ;;  %v839_v8 = vsel %vm662_vm2, %v836_v60, %v838_v5  ;;  %v2191_v9 = vld [vmem:[%s2353_s25 + $0x38] sm:$0xff]  }
  0x52   : > { %337 = vmatprep.subr.bf16.mxu0 %v2287_v0  ;;  %559 = vmatprep.subr.bf16.mxu1 %v2287_v0  ;;  %v864_v11 = vsel %vm290_vm0, %v839_v8, 0  ;;  %v840_v13 = vrot.slane %v2191_v9, 1  ;;  %v2203_v8 = vld [vmem:[%s2353_s25 + $0x18] sm:$0xff]  }
  0x54   : > { %v841_v17 = vsel %vm662_vm2, %v838_v5, %v840_v13  ;;  %v843_v25 = vsel %vm662_vm2, %v840_v13, %v842_v21  ;;  %v1028_v5 = vrot.slane %v1026_v63, 2  ;;  %v1032_v13 = vshrl.u32 %v2204_v6, 16  ;;  %v2212_v63 = vld [vmem:[%s2353_s25 + $0x48] sm:$0xff]  }
  0x55   : > { %v870_v29 = vsel %vm290_vm0, %v843_v25, 0 }
  0x59   : > { %338 = vmatpush1.bf16.xpose.msra.mxu0 %v319_v19  ;;  %560 = vmatpush1.bf16.xpose.msra.mxu1 %v540_v20  ;;  %v867_v19 = vsel %vm290_vm0, %v841_v17, 0  ;;  %v678_v20 = vrot.slane %v2192_v15, 1  ;;  %v1236_v15 = vrot.slane %v2203_v8, 2  ;;  %v1034_v17 = vrot.slane %v1032_v13, 1 }
  0x5a   : > { %712 = vmatprep.subr.bf16.mxu0 %v2287_v0  ;;  %561 = vmatprep.subr.bf16.mxu1 %v2287_v0  ;;  %v1071_v8 = vshll.u32 %v2212_v63, 16  ;;  %v2214_v13 = vld [vmem:[%s2353_s25 + $0x50] ss:$0 sps:$4 sm:$0x33]  }
  0x5b   : > { %v679_v24 = vsel %vm662_vm2, %v676_v12, %v678_v20  ;;  %v1029_v12 = vor.u32 %v1028_v5, %v1025_v4 }
  0x5c   : > { %v707_v28 = vsel %vm290_vm0, %v679_v24, 0 }
  0x60   : > { %2014 = vmatmul.mubr.msk.bf16.vlgmr.msra.gmra.mrb[0].mxu0 %vm290_vm0, %v244_v30  ;;  %v680_v30 = vrot.slane %v2194_v22, 1 }
  0x61   : > { %713 = vmatpush1.bf16.xpose.msra.mxu0 %v686_v31  ;;  %744 = vmatprep.mubr.bf16.mxu0 %v2287_v0  ;;  %v844_v31 = vrot.slane %v2195_v23, 1 }
  0x62   : > { %562 = vmatpush1.bf16.xpose.msra.mxu1 %v543_v33  ;;  %714 = vmatprep.subr.bf16.mxu0 %v2287_v0  ;;  %v1000_v33 = vshll.u32 %v2196_v26, 16  ;;  %v681_v36 = vsel %vm662_vm2, %v678_v20, %v680_v30 }
  0x63   : > { %878 = vmatprep.subr.bf16.mxu1 %v2287_v0  ;;  %v845_v37 = vsel %vm662_vm2, %v842_v21, %v844_v31  ;;  %v710_v44 = vsel %vm290_vm0, %v681_v36, 0  ;;  %v2205_v21 = vld [vmem:[%s2353_s25 + $0x20] sm:$0xff]  }
  0x64   : > { %v873_v45 = vsel %vm290_vm0, %v845_v37, 0  ;;  %v1238_v27 = vrot.slane %v2205_v21, 2 }
  0x69   : > { %715 = vmatpush1.bf16.xpose.msra.mxu0 %v689_v41  ;;  %2026 = vmatmul.mubr.msk.bf16.vlgmr.msra.gmra.mrb[0].mxu1 %vm290_vm0, %v2015_v39  ;;  %v1002_v39 = vrot.slane %v1000_v33, 2  ;;  %v1010_v41 = vrot.slane %v1008_v35, 2  ;;  %v1239_v33 = vsel %vm1232_vm4, %v1236_v15, %v1238_v27 }
  0x6a   : > { %879 = vmatpush1.bf16.xpose.msra.mxu1 %v852_v43  ;;  %716 = vmatprep.subr.bf16.mxu0 %v2287_v0  ;;  %v2198_v43 = vld [vmem:[%s2353_s25 + $0x50] ss:$0 sps:$4 sm:$0x11]  }
  0x6b   : > { %880 = vmatprep.subr.bf16.mxu1 %v2287_v0  ;;  %910 = vmatprep.mubr.bf16.mxu1 %v2287_v0  ;;  %v1003_v46 = vor.u32 %v1002_v39, %v999_v38  ;;  %v1011_v47 = vor.u32 %v1010_v41, %v1007_v40  ;;  %v846_v50 = vrot.slane %v2198_v43, 1  ;;  %v1262_v38 = vsel %vm290_vm0, %v1239_v33, 0  ;;  %v2217_v33 = vld [vmem:[%s2353_s25 + $0x18] sm:$0xff]  }
  0x6c   : > { %v2288_v40 = vmov 839922192  }
  0x6d   : > { %v847_v55 = vsel %vm662_vm2, %v844_v31, %v846_v50  ;;  %v214_v41 = vunpack.c.l.s4 %v2288_v40  ;;  %v2209_v50 = vld [vmem:[%s2353_s25 + $0x30] sm:$0xff]  }
  0x6e   : > { %v876_v60 = vsel %vm290_vm0, %v847_v55, 0 }
  0x6f   : > { %v215_v48 = vunpack.c.0.s8 %v214_v41  ;;  %v1400_v41 = vrot.slane %v2217_v33, 2 }
  0x71   : > { %717 = vmatpush1.bf16.xpose.msra.mxu0 %v692_v49  ;;  %v1017_v49 = vshll.u32 %v2199_v42, 16  ;;  %v216_v42 = vlaneseq }
  0x72   : > { %881 = vmatpush1.bf16.xpose.msra.mxu1 %v855_v51  ;;  %718 = vmatprep.subr.bf16.mxu0 %v2287_v0  ;;  %v1012_v51 = vsel %vm995_vm3, %v1003_v46, %v1011_v47 }
  0x73   : > { %882 = vmatprep.subr.bf16.mxu1 %v2287_v0  ;;  %v1019_v53 = vrot.slane %v1017_v49, 2  ;;  %v217_v49 = vshrl.u32 %v216_v42, 7 }
  0x75   : > { %v1020_v61 = vor.u32 %v1019_v53, %v1016_v52  ;;  %v218_v56 = vsub.s32 %v215_v48, %v217_v49  ;;  %v2219_v49 = vld [vmem:[%s2353_s25 + $0x20] sm:$0xff]  }
  0x77   : > { %v1030_v16 = vsel %vm995_vm3, %v1020_v61, %v1029_v12 }
  0x78   : > { %v1095_v22 = vsel %vm290_vm0, %v1030_v16, 0 }
  0x79   : > { %719 = vmatpush1.bf16.xpose.msra.mxu0 %v695_v57  ;;  %v2201_v57 = vld [vmem:[%s2353_s25 + $0x10] sm:$0xff]  }
  0x7a   : > { %883 = vmatpush1.bf16.xpose.msra.mxu1 %v858_v59  ;;  %720 = vmatprep.subr.bf16.mxu0 %v2287_v0  ;;  %v1089_v59 = vsel %vm290_vm0, %v1012_v51, 0 }
  0x7b   : > { %884 = vmatprep.subr.bf16.mxu1 %v2287_v0 }
  0x81   : > { %721 = vmatpush1.bf16.xpose.msra.mxu0 %v698_v2  ;;  %v1234_v2 = vrot.slane %v2201_v57, 2  ;;  %v1242_v57 = vrot.slane %v2209_v50, 2 }
  0x82   : > { %885 = vmatpush1.bf16.xpose.msra.mxu1 %v861_v3  ;;  %722 = vmatprep.subr.bf16.mxu0 %v2287_v0  ;;  %v1021_v3 = vsel %vm995_vm3, %v1011_v47, %v1020_v61 }
  0x83   : > { %886 = vmatprep.subr.bf16.mxu1 %v2287_v0  ;;  %v1235_v7 = vsel %vm1232_vm4, %v1233_v1, %v1234_v2  ;;  %v1092_v9 = vsel %vm290_vm0, %v1021_v3, 0  ;;  %v1237_v20 = vsel %vm1232_vm4, %v1234_v2, %v1236_v15  ;;  %v2211_v3 = vld [vmem:[%s2353_s25 + $0x38] sm:$0xff]   ;;  %v2213_v15 = vld [vmem:[%s2353_s25 + $0x40] sm:$0xff]  }
  0x84   : > { %v1259_v23 = vsel %vm290_vm0, %v1237_v20, 0  ;;  %v1080_v20 = vshll.u32 %v2214_v13, 16  ;;  %v1246_v21 = vrot.slane %v2213_v15, 2  ;;  %v2224_v15 = vld [vmem:[%s2353_s25 + $0x30] sm:$0xff]  }
  0x89   : > { %723 = vmatpush1.bf16.xpose.msra.mxu0 %v701_v10  ;;  %v2039_v10 = vld [vmem:[%s2769_s1 + $0x6] sm:$0x3] }
  0x8a   : > { %887 = vmatpush1.bf16.xpose.msra.mxu1 %v864_v11  ;;  %724 = vmatprep.subr.bf16.mxu0 %v2287_v0  ;;  %v1256_v11 = vsel %vm290_vm0, %v1235_v7, 0  ;;  %v1068_v7 = vshrl.u32 %v2212_v63, 16 }
  0x8b   : > { %888 = vmatprep.subr.bf16.mxu1 %v2287_v0 }
  0x91   : > { %725 = vmatpush1.bf16.xpose.msra.mxu0 %v704_v18  ;;  %v1037_v18 = vrot.slane %v1035_v14, 2 }
  0x92   : > { %889 = vmatpush1.bf16.xpose.msra.mxu1 %v867_v19  ;;  %726 = vmatprep.subr.bf16.mxu0 %v2287_v0  ;;  %v2206_v19 = vld [vmem:[%s2353_s25 + $0x30] sm:$0xff]  }
  0x93   : > { %890 = vmatprep.subr.bf16.mxu1 %v2287_v0  ;;  %v1038_v24 = vor.u32 %v1037_v18, %v1034_v17  ;;  %v1041_v25 = vshrl.u32 %v2206_v19, 16  ;;  %v1044_v26 = vshll.u32 %v2206_v19, 16  ;;  %v1077_v19 = vshrl.u32 %v2214_v13, 16 }
  0x95   : > { %v1039_v30 = vsel %vm995_vm3, %v1029_v12, %v1038_v24  ;;  %v1043_v31 = vrot.slane %v1041_v25, 1  ;;  %v1046_v32 = vrot.slane %v1044_v26, 2  ;;  %v1073_v12 = vrot.slane %v1071_v8, 2  ;;  %v2215_v26 = vld [vmem:[%s2353_s25 + $0x48] sm:$0xff]  }
  0x96   : > { %v1098_v34 = vsel %vm290_vm0, %v1039_v30, 0  ;;  %v1248_v30 = vrot.slane %v2215_v26, 2  ;;  %v2063_v8 = vld [vmem:[%s2769_s1 + $0xa] sm:$0x3] }
  0x97   : > { %v1047_v39 = vor.u32 %v1046_v32, %v1043_v31  ;;  %v2216_v32 = vld [vmem:[%s2353_s25 + $0x10] sm:$0xfc]  }
  0x98   : > { %v1399_v40 = vrot.slane %v2216_v32, 2 }
  0x99   : > { %727 = vmatpush1.bf16.xpose.msra.mxu0 %v707_v28  ;;  %v2207_v28 = vld [vmem:[%s2353_s25 + $0x28] sm:$0xff]   ;;  %v1048_v46 = vsel %vm995_vm3, %v1038_v24, %v1047_v39  ;;  %v1082_v24 = vrot.slane %v1080_v20, 2 }
  0x9a   : > { %891 = vmatpush1.bf16.xpose.msra.mxu1 %v870_v29  ;;  %728 = vmatprep.subr.bf16.mxu0 %v2287_v0  ;;  %v2208_v29 = vld [vmem:[%s2353_s25 + $0x38] sm:$0xff]   ;;  %v1240_v35 = vrot.slane %v2207_v28, 2  ;;  %v1101_v51 = vsel %vm290_vm0, %v1048_v46, 0 }
  0x9b   : > { %892 = vmatprep.subr.bf16.mxu1 %v2287_v0  ;;  %v1050_v36 = vshrl.u32 %v2208_v29, 16  ;;  %v1053_v37 = vshll.u32 %v2208_v29, 16 }
  0x9c   : > { %v1241_v47 = vsel %vm1232_vm4, %v1238_v27, %v1240_v35  ;;  %v1243_v2 = vsel %vm1232_vm4, %v1240_v35, %v1242_v57  ;;  %v1249_v35 = vsel %vm1232_vm4, %v1246_v21, %v1248_v30 }
  0x9d   : > { %v1052_v43 = vrot.slane %v1050_v36, 1  ;;  %v1265_v52 = vsel %vm290_vm0, %v1241_v47, 0  ;;  %v1268_v5 = vsel %vm290_vm0, %v1243_v2, 0  ;;  %v2220_v36 = vld [vmem:[%s2353_s25 + $0x10] sm:$0xfc]   ;;  %v1401_v47 = vsel %vm1232_vm4, %v1399_v40, %v1400_v41  ;;  %v2222_v2 = vld [vmem:[%s2353_s25 + $0x28] sm:$0xff]  }
  0xa1   : > { %729 = vmatpush1.bf16.xpose.msra.mxu0 %v710_v44  ;;  %v1055_v44 = vrot.slane %v1053_v37, 2  ;;  %v2221_v37 = vld [vmem:[%s2353_s25 + $0x18] sm:$0xff]  }
  0xa2   : > { %893 = vmatpush1.bf16.xpose.msra.mxu1 %v873_v45  ;;  %1115 = vmatprep.subr.bf16.mxu0 %v2287_v0  ;;  %v2210_v45 = vld [vmem:[%s2353_s25 + $0x40] sm:$0xff]   ;;  %v1578_v46 = vshll.u32 %v2221_v37, 16 }
  0xa3   : > { %894 = vmatprep.subr.bf16.mxu1 %v2287_v0  ;;  %v1056_v53 = vor.u32 %v1055_v44, %v1052_v43  ;;  %v1059_v54 = vshrl.u32 %v2210_v45, 16  ;;  %v1062_v55 = vshll.u32 %v2210_v45, 16  ;;  %v1567_v43 = vshrl.u32 %v2220_v36, 16 }
  0xa4   : > { %v1570_v44 = vshll.u32 %v2220_v36, 16  ;;  %v1575_v45 = vshrl.u32 %v2221_v37, 16 }
  0xa5   : > { %v1061_v61 = vrot.slane %v1059_v54, 1  ;;  %v1064_v62 = vrot.slane %v1062_v55, 2  ;;  %v1569_v50 = vrot.slane %v1567_v43, 2  ;;  %v2223_v54 = vld [vmem:[%s2353_s25 + $0x20] sm:$0xff]   ;;  %v2051_v55 = vld [vmem:[%s2769_s1 + $0x8] sm:$0x3] }
  0xa6   : > { %v1587_v63 = vshll.u32 %v2223_v54, 16  ;;  %v2231_v43 = vld [vmem:[%s2353_s25 + $0x40] sm:$0xff]  }
  0xa7   : > { %v1065_v6 = vor.u32 %v1064_v62, %v1061_v61  ;;  %v1584_v62 = vshrl.u32 %v2223_v54, 16 }
  0xa8   : > { %2038 = vmatmul.mubr.msk.bf16.vlgmr.msra.gmra.mrb[4].mxu0 %vm290_vm0, %v2027_v58 }
  0xa9   : > { %1116 = vmatpush1.bf16.xpose.msra.mxu0 %v1089_v59  ;;  %1147 = vmatprep.mubr.bf16.mxu0 %v2287_v0  ;;  %v212_v59 = vpop.permute.xlu0 %211 }
  0xaa   : > { %895 = vmatpush1.bf16.xpose.msra.mxu1 %v876_v60  ;;  %1117 = vmatprep.subr.bf16.mxu0 %v2287_v0  ;;  %v1057_v60 = vsel %vm995_vm3, %v1047_v39, %v1056_v53  ;;  %v219_v1 = vrot.slane %v212_v59, %v218_v56  ;;  %v1277_v39 = vsel %vm290_vm0, %v1249_v35, 0  ;;  %v1422_v56 = vsel %vm290_vm0, %v1401_v47, 0 }
  0xab   : > { %1282 = vmatprep.subr.bf16.mxu1 %v2287_v0  ;;  %v1104_v4 = vsel %vm290_vm0, %v1057_v60, 0  ;;  %v1402_v59 = vrot.slane %v2219_v49, 2  ;;  %v1623_v49 = vshll.u32 %v2231_v43, 16 }
  0xac   : > { %224 = vst.msk [vmem:[#allocation2] sm:$0x77] %vm2556_vm7, %v219_v1 }
  0xad   : > { %v1403_v1 = vsel %vm1232_vm4, %v1400_v41, %v1402_v59  ;;  %v1625_v54 = vrot.slane %v1623_v49, 3 }
  0xb1   : > { %1118 = vmatpush1.bf16.xpose.msra.mxu0 %v1092_v9  ;;  %2050 = vmatmul.mubr.msk.bf16.vlgmr.msra.gmra.mrb[4].mxu1 %vm290_vm0, %v2039_v10  ;;  %v1244_v9 = vrot.slane %v2211_v3, 2  ;;  %v1066_v10 = vsel %vm995_vm3, %v1056_v53, %v1065_v6  ;;  %v1580_v53 = vrot.slane %v1578_v46, 3 }
  0xb2   : > { %1283 = vmatpush1.bf16.xpose.msra.mxu1 %v1256_v11  ;;  %1119 = vmatprep.subr.bf16.mxu0 %v2287_v0  ;;  %v1070_v11 = vrot.slane %v1068_v7, 1  ;;  %v1107_v16 = vsel %vm290_vm0, %v1066_v10, 0  ;;  %v1425_v7 = vsel %vm290_vm0, %v1403_v1, 0  ;;  %v1404_v10 = vrot.slane %v2222_v2, 2  ;;  %v2232_v1 = vld [vmem:[%s2353_s25 + $0x50] sm:$0xff]  }
  0xb3   : > { %1284 = vmatprep.subr.bf16.mxu1 %v2287_v0  ;;  %1314 = vmatprep.mubr.bf16.mxu1 %v2287_v0  ;;  %v1245_v14 = vsel %vm1232_vm4, %v1242_v57, %v1244_v9  ;;  %v1247_v25 = vsel %vm1232_vm4, %v1244_v9, %v1246_v21 }
  0xb4   : > { %v1271_v17 = vsel %vm290_vm0, %v1245_v14, 0  ;;  %v1074_v18 = vor.u32 %v1073_v12, %v1070_v11  ;;  %v1274_v28 = vsel %vm290_vm0, %v1247_v25, 0  ;;  %v1405_v14 = vsel %vm1232_vm4, %v1402_v59, %v1404_v10 }
  0xb5   : > { %v1428_v20 = vsel %vm290_vm0, %v1405_v14, 0 }
  0xb9   : > { %1120 = vmatpush1.bf16.xpose.msra.mxu0 %v1095_v22  ;;  %v1075_v22 = vsel %vm995_vm3, %v1065_v6, %v1074_v18  ;;  %v2225_v6 = vld [vmem:[%s2353_s25 + $0x28] sm:$0xff]  }
  0xba   : > { %1285 = vmatpush1.bf16.xpose.msra.mxu1 %v1259_v23  ;;  %1121 = vmatprep.subr.bf16.mxu0 %v2287_v0  ;;  %v1079_v23 = vrot.slane %v1077_v19, 1  ;;  %v1110_v27 = vsel %vm290_vm0, %v1075_v22, 0  ;;  %v1593_v12 = vshrl.u32 %v2225_v6, 16  ;;  %v1596_v13 = vshll.u32 %v2225_v6, 16  ;;  %v2227_v19 = vld [vmem:[%s2353_s25 + $0x30] sm:$0xff]  }
  0xbb   : > { %1286 = vmatprep.subr.bf16.mxu1 %v2287_v0  ;;  %v1406_v22 = vrot.slane %v2224_v15, 2  ;;  %v1605_v25 = vshll.u32 %v2227_v19, 16 }
  0xbc   : > { %v1083_v29 = vor.u32 %v1082_v24, %v1079_v23  ;;  %v1602_v24 = vshrl.u32 %v2227_v19, 16 }
  0xbd   : > { %v1407_v26 = vsel %vm1232_vm4, %v1404_v10, %v1406_v22 }
  0xbe   : > { %v1084_v31 = vsel %vm995_vm3, %v1074_v18, %v1083_v29  ;;  %v1598_v18 = vrot.slane %v1596_v13, 3  ;;  %v1604_v29 = vrot.slane %v1602_v24, 2  ;;  %v1431_v32 = vsel %vm290_vm0, %v1407_v26, 0  ;;  %v2234_v13 = vld [vmem:[%s2353_s25 + $0x58] ss:$0 sps:$4 sm:$0x33]  }
  0xbf   : > { %v2237_v26 = vld [vmem:[%s2353_s25 + $0x18] sm:$0xff]  }
  0xc1   : > { %1122 = vmatpush1.bf16.xpose.msra.mxu0 %v1098_v34  ;;  %v2218_v34 = vld [vmem:[%s2353_s25 + $0x50] ss:$0 sps:$4 sm:$0x33]  }
  0xc2   : > { %1287 = vmatpush1.bf16.xpose.msra.mxu1 %v1262_v38  ;;  %1123 = vmatprep.subr.bf16.mxu0 %v2287_v0  ;;  %v1113_v38 = vsel %vm290_vm0, %v1084_v31, 0  ;;  %v1250_v42 = vrot.slane %v2218_v34, 2  ;;  %v2229_v31 = vld [vmem:[%s2353_s25 + $0x38] sm:$0xff]  }
  0xc3   : > { %1288 = vmatprep.subr.bf16.mxu1 %v2287_v0  ;;  %v1611_v36 = vshrl.u32 %v2229_v31, 16  ;;  %v1614_v37 = vshll.u32 %v2229_v31, 16 }
  0xc4   : > { %v1251_v48 = vsel %vm1232_vm4, %v1248_v30, %v1250_v42  ;;  %v1607_v30 = vrot.slane %v1605_v25, 3  ;;  %v2236_v25 = vld [vmem:[%s2353_s25 + $0x10] sm:$0xf8]  }
  0xc5   : > { %v1280_v57 = vsel %vm290_vm0, %v1251_v48, 0  ;;  %v1613_v41 = vrot.slane %v1611_v36, 2  ;;  %v1616_v42 = vrot.slane %v1614_v37, 3  ;;  %v1620_v48 = vshrl.u32 %v2231_v43, 16  ;;  %v2239_v37 = vld [vmem:[%s2353_s25 + $0x20] sm:$0xff]  }
  0xc6   : > { %v1608_v35 = vor.u32 %v1607_v30, %v1604_v29  ;;  %v2075_v43 = vld [vmem:[%s2769_s1 + $0xc] sm:$0x3] }
  0xc7   : > { %v1617_v47 = vor.u32 %v1616_v42, %v1613_v41 }
  0xc9   : > { %1124 = vmatpush1.bf16.xpose.msra.mxu0 %v1101_v51  ;;  %v1572_v51 = vrot.slane %v1570_v44, 3 }
  0xca   : > { %1289 = vmatpush1.bf16.xpose.msra.mxu1 %v1265_v52  ;;  %1125 = vmatprep.subr.bf16.mxu0 %v2287_v0  ;;  %v1577_v52 = vrot.slane %v1575_v45, 2 }
  0xcb   : > { %1290 = vmatprep.subr.bf16.mxu1 %v2287_v0  ;;  %v1573_v60 = vor.u32 %v1572_v51, %v1569_v50  ;;  %v2230_v51 = vld [vmem:[%s2353_s25 + $0x48] sm:$0xff]  }
  0xcc   : > { %v1581_v61 = vor.u32 %v1580_v53, %v1577_v52  ;;  %v1618_v52 = vsel %vm1565_vm8, %v1608_v35, %v1617_v47  ;;  %v1622_v53 = vrot.slane %v1620_v48, 2  ;;  %v1412_v59 = vrot.slane %v2230_v51, 2 }
  0xcd   : > { %v1806_v48 = vrot.slane %v2239_v37, 3 }
  0xce   : > { %v1582_v3 = vsel %vm1565_vm8, %v1573_v60, %v1581_v61  ;;  %v1626_v60 = vor.u32 %v1625_v54, %v1622_v53 }
  0xcf   : > { %v1659_v9 = vsel %vm290_vm0, %v1582_v3, 0 }
  0xd0   : > { %v1627_v2 = vsel %vm1565_vm8, %v1617_v47, %v1626_v60 }
  0xd1   : > { %1126 = vmatpush1.bf16.xpose.msra.mxu0 %v1104_v4  ;;  %v1586_v4 = vrot.slane %v1584_v62, 2 }
  0xd2   : > { %1291 = vmatpush1.bf16.xpose.msra.mxu1 %v1268_v5  ;;  %1127 = vmatprep.subr.bf16.mxu0 %v2287_v0  ;;  %v1589_v5 = vrot.slane %v1587_v63, 3 }
  0xd3   : > { %1292 = vmatprep.subr.bf16.mxu1 %v2287_v0 }
  0xd4   : > { %v1590_v11 = vor.u32 %v1589_v5, %v1586_v4  ;;  %v2235_v5 = vld [vmem:[%s2353_s25 + $0x50] sm:$0xff]  }
  0xd5   : > { %v1638_v10 = vshrl.u32 %v2235_v5, 16 }
  0xd7   : > { %v1640_v15 = vrot.slane %v1638_v10, 2 }
  0xd9   : > { %1128 = vmatpush1.bf16.xpose.msra.mxu0 %v1107_v16  ;;  %v1591_v16 = vsel %vm1565_vm8, %v1581_v61, %v1590_v11 }
  0xda   : > { %1293 = vmatpush1.bf16.xpose.msra.mxu1 %v1271_v17  ;;  %1129 = vmatprep.subr.bf16.mxu0 %v2287_v0  ;;  %v1595_v17 = vrot.slane %v1593_v12, 2  ;;  %v1662_v21 = vsel %vm290_vm0, %v1591_v16, 0 }
  0xdb   : > { %1294 = vmatprep.subr.bf16.mxu1 %v2287_v0 }
  0xdc   : > { %v1599_v23 = vor.u32 %v1598_v18, %v1595_v17  ;;  %v2238_v17 = vld [vmem:[%s2353_s25 + $0x58] ss:$0 sps:$4 sm:$0x77]  }
  0xde   : > { %v1609_v40 = vsel %vm1565_vm8, %v1599_v23, %v1608_v35 }
  0xdf   : > { %v1668_v45 = vsel %vm290_vm0, %v1609_v40, 0 }
  0xe1   : > { %1130 = vmatpush1.bf16.xpose.msra.mxu0 %v1110_v27  ;;  %v2226_v27 = vld [vmem:[%s2353_s25 + $0x38] sm:$0xff]  }
  0xe2   : > { %1295 = vmatpush1.bf16.xpose.msra.mxu1 %v1274_v28  ;;  %1131 = vmatprep.subr.bf16.mxu0 %v2287_v0  ;;  %v1600_v28 = vsel %vm1565_vm8, %v1590_v11, %v1599_v23  ;;  %v1408_v34 = vrot.slane %v2226_v27, 2  ;;  %v1641_v11 = vshll.u32 %v2235_v5, 16  ;;  %v1650_v23 = vshll.u32 %v2238_v17, 16 }
  0xe3   : > { %1296 = vmatprep.subr.bf16.mxu1 %v2287_v0  ;;  %v1665_v33 = vsel %vm290_vm0, %v1600_v28, 0 }
  0xe4   : > { %v1643_v16 = vrot.slane %v1641_v11, 3  ;;  %v1652_v29 = vrot.slane %v1650_v23, 3 }
  0xe9   : > { %1132 = vmatpush1.bf16.xpose.msra.mxu0 %v1113_v38  ;;  %v1409_v38 = vsel %vm1232_vm4, %v1406_v22, %v1408_v34  ;;  %v1647_v22 = vshrl.u32 %v2238_v17, 16 }
  0xea   : > { %1297 = vmatpush1.bf16.xpose.msra.mxu1 %v1277_v39  ;;  %1448 = vmatprep.subr.bf16.mxu0 %v2287_v0  ;;  %v2228_v39 = vld [vmem:[%s2353_s25 + $0x40] sm:$0xff]   ;;  %v1434_v44 = vsel %vm290_vm0, %v1409_v38, 0 }
  0xeb   : > { %1298 = vmatprep.subr.bf16.mxu1 %v2287_v0  ;;  %v1410_v46 = vrot.slane %v2228_v39, 2  ;;  %v1649_v28 = vrot.slane %v1647_v22, 2  ;;  %v243_v38 = vld [vmem:[#allocation2] sm:$0x77] }
  0xed   : > { %v1411_v50 = vsel %vm1232_vm4, %v1408_v34, %v1410_v46  ;;  %v1413_v63 = vsel %vm1232_vm4, %v1410_v46, %v1412_v59  ;;  %v1653_v34 = vor.u32 %v1652_v29, %v1649_v28  ;;  %v2099_v29 = vld [vmem:[%s2769_s1 + $0x10] sm:$0x3] }
  0xee   : > { %v1440_v6 = vsel %vm290_vm0, %v1413_v63, 0  ;;  %v2241_v63 = vld [vmem:[%s2353_s25 + $0x30] sm:$0xff]  }
  0xf0   : > { %2062 = vmatmul.mubr.msk.bf16.vlgmr.msra.gmra.mrb[8].mxu0 %vm290_vm0, %v2051_v55  ;;  %v2233_v55 = vld [vmem:[%s2353_s25 + $0x48] sm:$0xff]  }
  0xf1   : > { %1449 = vmatpush1.bf16.xpose.msra.mxu0 %v1422_v56  ;;  %1480 = vmatprep.mubr.bf16.mxu0 %v2287_v0  ;;  %v1437_v56 = vsel %vm290_vm0, %v1411_v50, 0  ;;  %v1629_v61 = vshrl.u32 %v2233_v55, 16  ;;  %v1632_v62 = vshll.u32 %v2233_v55, 16  ;;  %v2240_v50 = vld [vmem:[%s2353_s25 + $0x28] sm:$0xff]  }
  0xf2   : > { %1299 = vmatpush1.bf16.xpose.msra.mxu1 %v1280_v57  ;;  %1450 = vmatprep.subr.bf16.mxu0 %v2287_v0  ;;  %v1671_v57 = vsel %vm290_vm0, %v1618_v52, 0  ;;  %v2087_v55 = vld [vmem:[%s2769_s1 + $0xe] sm:$0x3] }
  0xf3   : > { %1685 = vmatprep.subr.bf16.mxu1 %v2287_v0  ;;  %v1631_v3 = vrot.slane %v1629_v61, 2  ;;  %v1634_v4 = vrot.slane %v1632_v62, 3 }
  0xf9   : > { %1451 = vmatpush1.bf16.xpose.msra.mxu0 %v1425_v7  ;;  %2074 = vmatmul.mubr.msk.bf16.vlgmr.msra.gmra.mrb[8].mxu1 %vm290_vm0, %v2063_v8  ;;  %v1674_v7 = vsel %vm290_vm0, %v1627_v2, 0  ;;  %v1414_v8 = vrot.slane %v2232_v1, 2  ;;  %v1810_v2 = vrot.slane %v2241_v63, 3 }
  0xfa   : > { %1686 = vmatpush1.bf16.xpose.msra.mxu1 %v1659_v9  ;;  %1452 = vmatprep.subr.bf16.mxu0 %v2287_v0  ;;  %v1635_v9 = vor.u32 %v1634_v4, %v1631_v3  ;;  %v2242_v4 = vld [vmem:[%s2353_s25 + $0x38] sm:$0xff]  }
  0xfb   : > { %1687 = vmatprep.subr.bf16.mxu1 %v2287_v0  ;;  %1717 = vmatprep.mubr.bf16.mxu1 %v2287_v0  ;;  %v1415_v12 = vsel %vm1232_vm4, %v1412_v59, %v1414_v8 }
  0xfc   : > { %v1636_v14 = vsel %vm1565_vm8, %v1626_v60, %v1635_v9  ;;  %v1443_v18 = vsel %vm290_vm0, %v1415_v12, 0  ;;  %v2244_v12 = vld [vmem:[%s2353_s25 + $0x48] sm:$0xff]  }
  0xfd   : > { %v1677_v19 = vsel %vm290_vm0, %v1636_v14, 0  ;;  %v1816_v14 = vrot.slane %v2244_v12, 3 }
 0x101   : > { %1453 = vmatpush1.bf16.xpose.msra.mxu0 %v1428_v20  ;;  %v1416_v20 = vrot.slane %v2234_v13, 2 }
 0x102   : > { %1688 = vmatpush1.bf16.xpose.msra.mxu1 %v1662_v21  ;;  %1454 = vmatprep.subr.bf16.mxu0 %v2287_v0  ;;  %v1644_v21 = vor.u32 %v1643_v16, %v1640_v15  ;;  %v2245_v16 = vld [vmem:[%s2353_s25 + $0x50] sm:$0xff]  }
 0x103   : > { %1689 = vmatprep.subr.bf16.mxu1 %v2287_v0  ;;  %v1417_v24 = vsel %vm1232_vm4, %v1414_v8, %v1416_v20  ;;  %v2243_v8 = vld [vmem:[%s2353_s25 + $0x40] sm:$0xff]   ;;  %v2246_v20 = vld [vmem:[%s2353_s25 + $0x58] ss:$0 sps:$4 sm:$0x77]   ;;  %s2002_s25 = sshll.u32 %s2787_s12, 1 }
 0x104   : > { %v1645_v27 = vsel %vm1565_vm8, %v1635_v9, %v1644_v21  ;;  %v1446_v30 = vsel %vm290_vm0, %v1417_v24, 0  ;;  %v1654_v40 = vsel %vm1565_vm8, %v1644_v21, %v1653_v34  ;;  %v1814_v10 = vrot.slane %v2243_v8, 3  ;;  %s204_s28 = sadd.s32 %s2003_s27, %s2002_s25 }
 0x105   : > { %v1680_v31 = vsel %vm290_vm0, %v1645_v27, 0  ;;  %v1683_v47 = vsel %vm290_vm0, %v1654_v40, 0  ;;  %v1820_v22 = vrot.slane %v2246_v20, 3  ;;  %s2004_s29 = sshll.u32 %s204_s28, 2 }
 0x106   : > { %v1817_v15 = vsel %vm1802_vm9, %v1814_v10, %v1816_v14  ;;  %s206_s5 = scalar_lea.vmem %s2771_s3, %s2004_s29 }
 0x107   : > { %v1844_v17 = vsel %vm290_vm0, %v1817_v15, 0 }
 0x109   : > { %1455 = vmatpush1.bf16.xpose.msra.mxu0 %v1431_v32  ;;  %v1803_v32 = vrot.slane %v2236_v25, 3 }
 0x10a   : > { %1690 = vmatpush1.bf16.xpose.msra.mxu1 %v1665_v33  ;;  %1456 = vmatprep.subr.bf16.mxu0 %v2287_v0  ;;  %v1804_v33 = vrot.slane %v2237_v26, 3 }
 0x10b   : > { %1691 = vmatprep.subr.bf16.mxu1 %v2287_v0 }
 0x10c   : > { %v1805_v36 = vsel %vm1802_vm9, %v1803_v32, %v1804_v33  ;;  %v1807_v49 = vsel %vm1802_vm9, %v1804_v33, %v1806_v48 }
 0x10d   : > { %v1829_v54 = vsel %vm290_vm0, %v1807_v49, 0 }
 0x111   : > { %1457 = vmatpush1.bf16.xpose.msra.mxu0 %v1434_v44 }
 0x112   : > { %1692 = vmatpush1.bf16.xpose.msra.mxu1 %v1668_v45  ;;  %1458 = vmatprep.subr.bf16.mxu0 %v2287_v0  ;;  %v1826_v45 = vsel %vm290_vm0, %v1805_v36, 0 }
 0x113   : > { %1693 = vmatprep.subr.bf16.mxu1 %v2287_v0 }
 0x119   : > { %1459 = vmatpush1.bf16.xpose.msra.mxu0 %v1437_v56 }
 0x11a   : > { %1694 = vmatpush1.bf16.xpose.msra.mxu1 %v1671_v57  ;;  %1460 = vmatprep.subr.bf16.mxu0 %v2287_v0  ;;  %v1808_v57 = vrot.slane %v2240_v50, 3 }
 0x11b   : > { %1695 = vmatprep.subr.bf16.mxu1 %v2287_v0 }
 0x11c   : > { %v1809_v62 = vsel %vm1802_vm9, %v1806_v48, %v1808_v57  ;;  %v1811_v3 = vsel %vm1802_vm9, %v1808_v57, %v1810_v2 }
 0x11d   : > { %v1832_v1 = vsel %vm290_vm0, %v1809_v62, 0  ;;  %v1835_v5 = vsel %vm290_vm0, %v1811_v3, 0 }
 0x121   : > { %1461 = vmatpush1.bf16.xpose.msra.mxu0 %v1440_v6  ;;  %v1812_v6 = vrot.slane %v2242_v4, 3 }
 0x122   : > { %1696 = vmatpush1.bf16.xpose.msra.mxu1 %v1674_v7  ;;  %1462 = vmatprep.subr.bf16.mxu0 %v2287_v0 }
 0x123   : > { %1697 = vmatprep.subr.bf16.mxu1 %v2287_v0  ;;  %v1813_v7 = vsel %vm1802_vm9, %v1810_v2, %v1812_v6  ;;  %v1815_v11 = vsel %vm1802_vm9, %v1812_v6, %v1814_v10 }
 0x124   : > { %v1838_v9 = vsel %vm290_vm0, %v1813_v7, 0  ;;  %v1841_v13 = vsel %vm290_vm0, %v1815_v11, 0 }
 0x129   : > { %1463 = vmatpush1.bf16.xpose.msra.mxu0 %v1443_v18  ;;  %v1818_v18 = vrot.slane %v2245_v16, 3 }
 0x12a   : > { %1698 = vmatpush1.bf16.xpose.msra.mxu1 %v1677_v19  ;;  %1464 = vmatprep.subr.bf16.mxu0 %v2287_v0 }
 0x12b   : > { %1699 = vmatprep.subr.bf16.mxu1 %v2287_v0  ;;  %v1819_v19 = vsel %vm1802_vm9, %v1816_v14, %v1818_v18  ;;  %v1821_v23 = vsel %vm1802_vm9, %v1818_v18, %v1820_v22 }
 0x12c   : > { %v1847_v21 = vsel %vm290_vm0, %v1819_v19, 0  ;;  %v1850_v24 = vsel %vm290_vm0, %v1821_v23, 0 }
 0x131   : > { %1465 = vmatpush1.bf16.xpose.msra.mxu0 %v1446_v30 }
 0x132   : > { %1700 = vmatpush1.bf16.xpose.msra.mxu1 %v1680_v31  ;;  %1852 = vmatprep.subr.bf16.mxu0 %v2287_v0 }
 0x133   : > { %v355_v35 = vpop.f32.mrb[0].mxu0  ;;  %1701 = vmatprep.subr.bf16.mxu1 %v2287_v0 }
 0x134   : > { %v357_v39 = vpop.f32.mrb[1].mxu0 }
 0x135   : > { %v364_v41 = vcombine.low %v355_v35, %v357_v39  ;;  %v359_v42 = vpop.f32.mrb[2].mxu0 }
 0x136   : > { %v360_v44 = vpop.f32.mrb[3].mxu0 }
 0x137   : > { %v366_v46 = vadd.f32 %v364_v41, %v243_v38 }
 0x138   : > { %2086 = vmatmul.mubr.msk.bf16.vlgmr.msra.gmra.mrb[12].mxu0 %vm290_vm0, %v2075_v43 }
 0x139   : > { %367 = vst.msk [vmem:[#allocation2] sm:$0x77] %vm2556_vm7, %v366_v46  ;;  %1853 = vmatpush1.bf16.xpose.msra.mxu0 %v1826_v45  ;;  %1884 = vmatprep.mubr.bf16.mxu0 %v2287_v0 }
 0x13a   : > { %1702 = vmatpush1.bf16.xpose.msra.mxu1 %v1683_v47  ;;  %1854 = vmatprep.subr.bf16.mxu0 %v2287_v0 }
 0x13c   : > { %v579_v51 = vpop.f32.mrb[0].mxu1 }
 0x13d   : > { %v581_v52 = vpop.f32.mrb[1].mxu1 }
 0x13e   : > { %v588_v53 = vcombine.low %v579_v51, %v581_v52  ;;  %v583_v56 = vpop.f32.mrb[2].mxu1 }
 0x13f   : > { %v584_v59 = vpop.f32.mrb[3].mxu1 }
 0x140   : > { %v387_v60 = vld [vmem:[#allocation2] sm:$0x77] }
 0x141   : > { %v590_v61 = vadd.f32 %v588_v53, %v387_v60  ;;  %1855 = vmatpush1.bf16.xpose.msra.mxu0 %v1829_v54  ;;  %2098 = vmatmul.mubr.msk.bf16.vlgmr.msra.gmra.mrb[12].mxu1 %vm290_vm0, %v2087_v55 }
 0x142   : > { %1856 = vmatprep.subr.bf16.mxu0 %v2287_v0 }
 0x143   : > { %591 = vst.msk [vmem:[#allocation2] sm:$0x77] %vm2556_vm7, %v590_v61 }
 0x149   : > { %1857 = vmatpush1.bf16.xpose.msra.mxu0 %v1832_v1 }
 0x14a   : > { %1858 = vmatprep.subr.bf16.mxu0 %v2287_v0  ;;  %v611_v30 = vld [vmem:[#allocation2] sm:$0x77] }
 0x151   : > { %1859 = vmatpush1.bf16.xpose.msra.mxu0 %v1835_v5 }
 0x152   : > { %1860 = vmatprep.subr.bf16.mxu0 %v2287_v0 }
 0x159   : > { %1861 = vmatpush1.bf16.xpose.msra.mxu0 %v1838_v9 }
 0x15a   : > { %1862 = vmatprep.subr.bf16.mxu0 %v2287_v0 }
 0x161   : > { %1863 = vmatpush1.bf16.xpose.msra.mxu0 %v1841_v13 }
 0x162   : > { %1864 = vmatprep.subr.bf16.mxu0 %v2287_v0 }
 0x169   : > { %1865 = vmatpush1.bf16.xpose.msra.mxu0 %v1844_v17 }
 0x16a   : > { %1866 = vmatprep.subr.bf16.mxu0 %v2287_v0 }
 0x171   : > { %1867 = vmatpush1.bf16.xpose.msra.mxu0 %v1847_v21 }
 0x172   : > { %1868 = vmatprep.subr.bf16.mxu0 %v2287_v0 }
 0x179   : > { %1869 = vmatpush1.bf16.xpose.msra.mxu0 %v1850_v24 }
 0x17b   : > { %v746_v25 = vpop.f32.mrb[4].mxu0 }
 0x17c   : > { %v748_v26 = vpop.f32.mrb[5].mxu0 }
 0x17d   : > { %v755_v27 = vcombine.low %v746_v25, %v748_v26  ;;  %v750_v28 = vpop.f32.mrb[6].mxu0 }
 0x17e   : > { %v751_v31 = vpop.f32.mrb[7].mxu0 }
 0x17f   : > { %v757_v32 = vadd.f32 %v755_v27, %v611_v30 }
 0x180   : > { %2110 = vmatmul.mubr.msk.bf16.vlgmr.msra.gmra.mrb[16].mxu0 %vm290_vm0, %v2099_v29 }
 0x181   : > { %758 = vst.msk [vmem:[#allocation2] sm:$0x77] %vm2556_vm7, %v757_v32 }
 0x184   : > { %v912_v0 = vpop.f32.mrb[4].mxu1 }
 0x185   : > { %v914_v33 = vpop.f32.mrb[5].mxu1 }
 0x186   : > { %v921_v34 = vcombine.low %v912_v0, %v914_v33  ;;  %v916_v35 = vpop.f32.mrb[6].mxu1 }
 0x187   : > { %v917_v36 = vpop.f32.mrb[7].mxu1 }
 0x188   : > { %v778_v37 = vld [vmem:[#allocation2] sm:$0x77] }
 0x189   : > { %v923_v38 = vadd.f32 %v921_v34, %v778_v37 }
 0x18b   : > { %924 = vst.msk [vmem:[#allocation2] sm:$0x77] %vm2556_vm7, %v923_v38 }
 0x192   : > { %v944_v43 = vld [vmem:[#allocation2] sm:$0x77] }
 0x1c3   : > { %v1149_v39 = vpop.f32.mrb[8].mxu0 }
 0x1c4   : > { %v1151_v40 = vpop.f32.mrb[9].mxu0 }
 0x1c5   : > { %v1158_v41 = vcombine.low %v1149_v39, %v1151_v40  ;;  %v1153_v42 = vpop.f32.mrb[10].mxu0 }
 0x1c6   : > { %v1154_v44 = vpop.f32.mrb[11].mxu0 }
 0x1c7   : > { %v1160_v45 = vadd.f32 %v1158_v41, %v944_v43 }
 0x1c9   : > { %1161 = vst.msk [vmem:[#allocation2] sm:$0x77] %vm2556_vm7, %v1160_v45 }
 0x1cc   : > { %v1316_v46 = vpop.f32.mrb[8].mxu1 }
 0x1cd   : > { %v1318_v47 = vpop.f32.mrb[9].mxu1 }
 0x1ce   : > { %v1325_v48 = vcombine.low %v1316_v46, %v1318_v47  ;;  %v1320_v49 = vpop.f32.mrb[10].mxu1 }
 0x1cf   : > { %v1321_v50 = vpop.f32.mrb[11].mxu1 }
 0x1d0   : > { %v1181_v51 = vld [vmem:[#allocation2] sm:$0x77] }
 0x1d1   : > { %v1327_v52 = vadd.f32 %v1325_v48, %v1181_v51 }
 0x1d3   : > { %1328 = vst.msk [vmem:[#allocation2] sm:$0x77] %vm2556_vm7, %v1327_v52 }
 0x1da   : > { %v1348_v57 = vld [vmem:[#allocation2] sm:$0x77] }
 0x20b   : > { %v1482_v53 = vpop.f32.mrb[12].mxu0 }
 0x20c   : > { %v1484_v54 = vpop.f32.mrb[13].mxu0 }
 0x20d   : > { %v1491_v55 = vcombine.low %v1482_v53, %v1484_v54  ;;  %v1486_v56 = vpop.f32.mrb[14].mxu0 }
 0x20e   : > { %v1487_v59 = vpop.f32.mrb[15].mxu0 }
 0x20f   : > { %v1493_v60 = vadd.f32 %v1491_v55, %v1348_v57 }
 0x211   : > { %1494 = vst.msk [vmem:[#allocation2] sm:$0x77] %vm2556_vm7, %v1493_v60 }
 0x214   : > { %v1719_v61 = vpop.f32.mrb[12].mxu1 }
 0x215   : > { %v1721_v62 = vpop.f32.mrb[13].mxu1 }
 0x216   : > { %v1728_v63 = vcombine.low %v1719_v61, %v1721_v62  ;;  %v1723_v1 = vpop.f32.mrb[14].mxu1 }
 0x217   : > { %v1724_v2 = vpop.f32.mrb[15].mxu1 }
 0x218   : > { %v1514_v3 = vld [vmem:[#allocation2] sm:$0x77] }
 0x219   : > { %v1730_v4 = vadd.f32 %v1728_v63, %v1514_v3 }
 0x21b   : > { %1731 = vst.msk [vmem:[#allocation2] sm:$0x77] %vm2556_vm7, %v1730_v4 }
 0x222   : > { %v1751_v9 = vld [vmem:[#allocation2] sm:$0x77] }
 0x253   : > { %v1886_v5 = vpop.f32.mrb[16].mxu0 }
 0x254   : > { %v1888_v6 = vpop.f32.mrb[17].mxu0 }
 0x255   : > { %v1895_v7 = vcombine.low %v1886_v5, %v1888_v6  ;;  %v1890_v8 = vpop.f32.mrb[18].mxu0 }
 0x256   : > { %v1891_v10 = vpop.f32.mrb[19].mxu0 }
 0x257   : > { %v1897_v11 = vadd.f32 %v1895_v7, %v1751_v9 }
 0x259   : > { %1898 = vst.msk [vmem:[#allocation2] sm:$0x77] %vm2556_vm7, %v1897_v11 }
 0x260   : > { %v1899_v12 = vld [vmem:[#allocation2] sm:$0x77] }
 0x261   : > { %1900 = vst.msk [vmem:[%s206_s5] sm:$0x77] %vm2556_vm7, %v1899_v12 }
 0x262 PF: > { %s13_s16 = sadd.s32 1, %s2285_s16   ;;  %s2774_s12 = smov %s2277_s14 }
 0x263   : > { %p10_p7 = scmp.ge.s32.totalorder %s13_s16, 6   ;;  %s2775_s13 = smov %s2281_s15 }
 0x264   : > { %s2776_s14 = smov %s2779_s17  ;;  %s2777_s15 = smov %s2783_s18 }
 0x265   :  { %12 = sbr.rel (!%p10_p7) target bundleno = 3 (0x3), region = 70 }

</bundles_post_ra>
